<compile_context>
chip_gen: v6e
topology: v6e:2x2x1
jax: 0.10.0
libtpu: 0.0.40
codegen_flags: <defaults>
</compile_context>

<pallas_src>
import jax
import jax.numpy as jnp
from jax.experimental import pallas as pl
from jax.experimental.pallas import tpu as pltpu

K_IN = 28 * 28     # 784
H0 = 512
H1 = 128
N_OUT = 10
N_PAD = 128        # lane-dense padded logit width
TM_MAX = 1024      # batch-tile cap: fits every generation's scoped VMEM budget


def mlp_kernel(x_ref, w0_ref, b0_ref, w1_ref, b1_ref, w2_ref, b2_ref, o_ref):
    # x tile: (TM, 784) f32 straight from HBM; cast to bf16 in-kernel so XLA
    # never runs a separate pad/cast pass over the activations.
    x = x_ref[...].astype(jnp.bfloat16)

    # Layer 0: bf16 MXU with f32 accumulate, f32 bias add, bf16 sigmoid.
    h0 = jnp.dot(x, w0_ref[...], preferred_element_type=jnp.float32) + b0_ref[...]
    h0 = jax.nn.sigmoid(h0.astype(jnp.bfloat16))

    # Layer 1.
    h1 = jnp.dot(h0, w1_ref[...], preferred_element_type=jnp.float32) + b1_ref[...]
    h1 = jax.nn.sigmoid(h1.astype(jnp.bfloat16))

    # Layer 2 (logits, padded to 128 lanes).
    logits = jnp.dot(h1, w2_ref[...], preferred_element_type=jnp.float32) + b2_ref[...]

    # log_softmax over the 128 padded lanes. Padded lanes carry a -1e30 bias,
    # so they never win the max and contribute exp(...) == 0 to the sum.
    m = jnp.max(logits, axis=-1, keepdims=True)
    shifted = logits - m
    lse = jnp.log(jnp.sum(jnp.exp(shifted), axis=-1, keepdims=True))
    o_ref[...] = (shifted - lse).astype(o_ref.dtype)


def _round_up(v, m):
    return (v + m - 1) // m * m


def _choose_tm(B):
    # Adaptive batch tile: big enough to amortize per-step pipeline overhead,
    # small enough for v7x's 32 MiB scoped VMEM, rounded to the 16-row bf16
    # sublane packing so tiny batches aren't padded to a full 128-row tile.
    tm = min(TM_MAX, _round_up(max(B, 1), 16))
    # v7x megacore: ensure the "parallel" batch axis has >= 2 grid steps so
    # both TensorCores get work (only worth splitting once tiles are sizable).
    if B >= 256 and pl.cdiv(B, tm) < 2:
        tm = _round_up(pl.cdiv(B, 2), 16)
    return tm


def mlp_forward(x_nchw, params, *, tm=None):
    """x_nchw: (B, 1, 28, 28) float32. params: torch-convention weights."""
    B = x_nchw.shape[0]
    x = x_nchw.reshape(B, -1).astype(jnp.float32)          # flatten(x, 1) -> (B, 784)

    if tm is None:
        tm = _choose_tm(B)
    bp = _round_up(B, tm)
    if bp != B:
        x = jnp.pad(x, ((0, bp - B), (0, 0)))

    # torch Linear weights are (out, in); transpose to (in, out) for x @ W.
    w0 = params["w0"].T.astype(jnp.bfloat16)                                          # (784, 512)
    w1 = params["w1"].T.astype(jnp.bfloat16)                                          # (512, 128)
    w2 = jnp.pad(params["w2"].T, ((0, 0), (0, N_PAD - N_OUT))).astype(jnp.bfloat16)   # (128, 128)
    b0 = params["b0"].reshape(1, -1).astype(jnp.float32)
    b1 = params["b1"].reshape(1, -1).astype(jnp.float32)
    # Padded logit lanes get a huge negative bias so log_softmax ignores them.
    b2 = jnp.concatenate(
        [params["b2"].astype(jnp.float32),
         jnp.full((N_PAD - N_OUT,), -1e30, jnp.float32)]).reshape(1, -1)

    grid = (bp // tm,)

    cost = pl.CostEstimate(
        flops=2 * B * (K_IN * H0 + H0 * H1 + H1 * N_OUT),
        transcendentals=B * (H0 + H1 + N_PAD),
        bytes_accessed=(x.size * 4 + (w0.size + w1.size + w2.size) * 2
                        + (b0.size + b1.size + b2.size) * 4 + bp * N_PAD * 4),
    )

    def build(single_buffer_weights):
        if single_buffer_weights:
            def resident(shape):
                return pl.BlockSpec(shape, lambda *_: (0,) * len(shape),
                                    pipeline_mode=pl.Buffered(1))
        else:
            def resident(shape):
                return pl.BlockSpec(shape, lambda *_: (0,) * len(shape))
        return pl.pallas_call(
            mlp_kernel,
            out_shape=jax.ShapeDtypeStruct((bp, N_PAD), jnp.float32),
            grid=grid,
            in_specs=[
                pl.BlockSpec((tm, K_IN), lambda i: (i, 0)),   # pipelined activations
                resident(w0.shape), resident(b0.shape),       # VMEM-resident weights
                resident(w1.shape), resident(b1.shape),
                resident(w2.shape), resident(b2.shape),
            ],
            out_specs=pl.BlockSpec((tm, N_PAD), lambda i: (i, 0)),
            compiler_params=pltpu.CompilerParams(
                dimension_semantics=("parallel",),   # shard batch steps across TCs (v7x)
                vmem_limit_bytes=32 << 20,
            ),
            cost_estimate=cost,
        )

    try:
        # Single-buffer the constant-index-map weight/bias operands.
        out = build(True)(x, w0, b0, w1, b1, w2, b2)
    except Exception:
        # Fallback for JAX versions without pipeline_mode / Buffered(1).
        out = build(False)(x, w0, b0, w1, b1, w2, b2)

    return out[:B, :N_OUT]


def init_params(key):
    # Deterministic synthetic init (shapes match nn.Linear in the module).
    ks = jax.random.split(key, 6)

    def lin(kw, kb, out_f, in_f):
        bound = 1.0 / (in_f ** 0.5)
        w = jax.random.uniform(kw, (out_f, in_f), jnp.float32, -bound, bound)
        b = jax.random.uniform(kb, (out_f,), jnp.float32, -bound, bound)
        return w, b

    w0, b0 = lin(ks[0], ks[1], H0, K_IN)
    w1, b1 = lin(ks[2], ks[3], H1, H0)
    w2, b2 = lin(ks[4], ks[5], N_OUT, H1)
    return {"w0": w0, "b0": b0, "w1": w1, "b1": b1, "w2": w2, "b2": b2}


def reference_forward(x_nchw, p):
    x = x_nchw.reshape(x_nchw.shape[0], -1)
    h0 = jax.nn.sigmoid(x @ p["w0"].T + p["b0"])
    h1 = jax.nn.sigmoid(h0 @ p["w1"].T + p["b1"])
    logits = h1 @ p["w2"].T + p["b2"]
    return jax.nn.log_softmax(logits, axis=1)


if __name__ == "__main__":
    key = jax.random.PRNGKey(0)
    kx, kp = jax.random.split(key)

    B = 8  # small sanity-check batch; tm adapts (16 rows here, up to 1024 at scale)
    x = jax.random.normal(kx, (B, 1, 28, 28), jnp.float32)  # NCHW like PyTorch
    params = init_params(kp)

    out = mlp_forward(x, params)
    out = jax.block_until_ready(out)

    ref = reference_forward(x, params)
    assert out.shape == (B, N_OUT)
    # bf16 matmul operands / bf16 sigmoid with f32 accumulation -> loosened tol.
    assert jnp.allclose(out, ref, atol=5e-2, rtol=5e-2)

    print("KERNEL_OK")
</pallas_src>

<mosaic_0001>
module attributes {stable_mosaic.version = 11 : i64} {
  func.func @mlp_kernel(%arg0: i32, %arg1: memref<16x784xf32, #tpu.memory_space<vmem>>, %arg2: memref<784x512xbf16, #tpu.memory_space<vmem>>, %arg3: memref<1x512xf32, #tpu.memory_space<vmem>>, %arg4: memref<512x128xbf16, #tpu.memory_space<vmem>>, %arg5: memref<1x128xf32, #tpu.memory_space<vmem>>, %arg6: memref<128x128xbf16, #tpu.memory_space<vmem>>, %arg7: memref<1x128xf32, #tpu.memory_space<vmem>>, %arg8: memref<16x128xf32, #tpu.memory_space<vmem>>) attributes {dimension_semantics = [#tpu.dimension_semantics<parallel>], iteration_bounds = array<i64: 1>, scalar_prefetch = 0 : i64, scratch_operands = 0 : i64, tpu.core_type = #tpu.core_type<tc>, window_params = [{transform_indices = @transform_0, window_bounds = array<i64: 16, 784>}, {pipeline_mode = #tpu.pipeline_mode<synchronous>, transform_indices = @transform_1, window_bounds = array<i64: 784, 512>}, {pipeline_mode = #tpu.pipeline_mode<synchronous>, transform_indices = @transform_2, window_bounds = array<i64: 1, 512>}, {pipeline_mode = #tpu.pipeline_mode<synchronous>, transform_indices = @transform_3, window_bounds = array<i64: 512, 128>}, {pipeline_mode = #tpu.pipeline_mode<synchronous>, transform_indices = @transform_4, window_bounds = array<i64: 1, 128>}, {pipeline_mode = #tpu.pipeline_mode<synchronous>, transform_indices = @transform_5, window_bounds = array<i64: 128, 128>}, {pipeline_mode = #tpu.pipeline_mode<synchronous>, transform_indices = @transform_6, window_bounds = array<i64: 1, 128>}, {transform_indices = @transform_7, window_bounds = array<i64: 16, 128>}]} {
    %c0 = arith.constant 0 : index
    %c0_0 = arith.constant 0 : index
    %0 = vector.load %arg1[%c0, %c0_0] : memref<16x784xf32, #tpu.memory_space<vmem>>, vector<16x784xf32>
    %1 = arith.truncf %0 : vector<16x784xf32> to vector<16x784xbf16>
    %c0_1 = arith.constant 0 : index
    %c0_2 = arith.constant 0 : index
    %2 = vector.load %arg2[%c0_1, %c0_2] : memref<784x512xbf16, #tpu.memory_space<vmem>>, vector<784x512xbf16>
    %cst = arith.constant dense<0.000000e+00> : vector<16x512xf32>
    %3 = tpu.matmul %1, %2, %cst {dimension_numbers = #tpu.dot_dimension_numbers<[1], [0], [0], [1], [0, 0, 1, 1], [], []>} : vector<16x784xbf16>, vector<784x512xbf16>, vector<16x512xf32> -> vector<16x512xf32>
    %c0_3 = arith.constant 0 : index
    %c0_4 = arith.constant 0 : index
    %4 = vector.load %arg3[%c0_3, %c0_4] : memref<1x512xf32, #tpu.memory_space<vmem>>, vector<1x512xf32>
    %5 = vector.broadcast %4 : vector<1x512xf32> to vector<16x512xf32>
    %6 = arith.addf %3, %5 : vector<16x512xf32>
    %7 = arith.truncf %6 : vector<16x512xf32> to vector<16x512xbf16>
    %8 = arith.negf %7 : vector<16x512xbf16>
    %9 = math.exp %8 : vector<16x512xbf16>
    %cst_5 = arith.constant 1.000000e+00 : bf16
    %10 = vector.broadcast %cst_5 : bf16 to vector<16x512xbf16>
    %11 = arith.addf %10, %9 : vector<16x512xbf16>
    %12 = arith.divf %10, %11 : vector<16x512xbf16>
    %c0_6 = arith.constant 0 : index
    %c0_7 = arith.constant 0 : index
    %13 = vector.load %arg4[%c0_6, %c0_7] : memref<512x128xbf16, #tpu.memory_space<vmem>>, vector<512x128xbf16>
    %cst_8 = arith.constant dense<0.000000e+00> : vector<16x128xf32>
    %14 = tpu.matmul %12, %13, %cst_8 {dimension_numbers = #tpu.dot_dimension_numbers<[1], [0], [0], [1], [0, 0, 1, 1], [], []>} : vector<16x512xbf16>, vector<512x128xbf16>, vector<16x128xf32> -> vector<16x128xf32>
    %c0_9 = arith.constant 0 : index
    %c0_10 = arith.constant 0 : index
    %15 = vector.load %arg5[%c0_9, %c0_10] : memref<1x128xf32, #tpu.memory_space<vmem>>, vector<1x128xf32>
    %16 = vector.broadcast %15 : vector<1x128xf32> to vector<16x128xf32>
    %17 = arith.addf %14, %16 : vector<16x128xf32>
    %18 = arith.truncf %17 : vector<16x128xf32> to vector<16x128xbf16>
    %19 = arith.negf %18 : vector<16x128xbf16>
    %20 = math.exp %19 : vector<16x128xbf16>
    %cst_11 = arith.constant 1.000000e+00 : bf16
    %21 = vector.broadcast %cst_11 : bf16 to vector<16x128xbf16>
    %22 = arith.addf %21, %20 : vector<16x128xbf16>
    %23 = arith.divf %21, %22 : vector<16x128xbf16>
    %c0_12 = arith.constant 0 : index
    %c0_13 = arith.constant 0 : index
    %24 = vector.load %arg6[%c0_12, %c0_13] : memref<128x128xbf16, #tpu.memory_space<vmem>>, vector<128x128xbf16>
    %cst_14 = arith.constant dense<0.000000e+00> : vector<16x128xf32>
    %25 = tpu.matmul %23, %24, %cst_14 {dimension_numbers = #tpu.dot_dimension_numbers<[1], [0], [0], [1], [0, 0, 1, 1], [], []>} : vector<16x128xbf16>, vector<128x128xbf16>, vector<16x128xf32> -> vector<16x128xf32>
    %c0_15 = arith.constant 0 : index
    %c0_16 = arith.constant 0 : index
    %26 = vector.load %arg7[%c0_15, %c0_16] : memref<1x128xf32, #tpu.memory_space<vmem>>, vector<1x128xf32>
    %27 = vector.broadcast %26 : vector<1x128xf32> to vector<16x128xf32>
    %28 = arith.addf %25, %27 : vector<16x128xf32>
    %cst_17 = arith.constant dense<0xFF800000> : vector<16xf32>
    %29 = vector.multi_reduction <maximumf>, %28, %cst_17 [1] : vector<16x128xf32> to vector<16xf32>
    %30 = vector.shape_cast %29 : vector<16xf32> to vector<16x1xf32>
    %31 = vector.broadcast %30 : vector<16x1xf32> to vector<16x128xf32>
    %32 = arith.subf %28, %31 : vector<16x128xf32>
    %33 = math.exp %32 : vector<16x128xf32>
    %cst_18 = arith.constant dense<0.000000e+00> : vector<16xf32>
    %34 = vector.multi_reduction <add>, %33, %cst_18 [1] : vector<16x128xf32> to vector<16xf32>
    %35 = vector.shape_cast %34 : vector<16xf32> to vector<16x1xf32>
    %36 = math.log %35 : vector<16x1xf32>
    %37 = vector.broadcast %36 : vector<16x1xf32> to vector<16x128xf32>
    %38 = arith.subf %32, %37 : vector<16x128xf32>
    %c0_19 = arith.constant 0 : index
    %c0_20 = arith.constant 0 : index
    %39 = vector.load %arg8[%c0_19, %c0_20] : memref<16x128xf32, #tpu.memory_space<vmem>>, vector<16x128xf32>
    tpu.vector_store %arg8[%c0_19, %c0_20], %38 {strides = array<i32>} : memref<16x128xf32, #tpu.memory_space<vmem>>, vector<16x128xf32>,
    return
  }
  func.func @transform_0(%arg0: i32) -> (i32, i32) {
    %c0_i32 = arith.constant 0 : i32
    %c0_i32_0 = arith.constant 0 : i32
    return %arg0, %c0_i32 : i32, i32
  }
  func.func @transform_1(%arg0: i32) -> (i32, i32) {
    %c0_i32 = arith.constant 0 : i32
    %c0_i32_0 = arith.constant 0 : i32
    %c0_i32_1 = arith.constant 0 : i32
    return %c0_i32, %c0_i32_0 : i32, i32
  }
  func.func @transform_2(%arg0: i32) -> (i32, i32) {
    %c0_i32 = arith.constant 0 : i32
    %c0_i32_0 = arith.constant 0 : i32
    %c0_i32_1 = arith.constant 0 : i32
    return %c0_i32, %c0_i32_0 : i32, i32
  }
  func.func @transform_3(%arg0: i32) -> (i32, i32) {
    %c0_i32 = arith.constant 0 : i32
    %c0_i32_0 = arith.constant 0 : i32
    %c0_i32_1 = arith.constant 0 : i32
    return %c0_i32, %c0_i32_0 : i32, i32
  }
  func.func @transform_4(%arg0: i32) -> (i32, i32) {
    %c0_i32 = arith.constant 0 : i32
    %c0_i32_0 = arith.constant 0 : i32
    %c0_i32_1 = arith.constant 0 : i32
    return %c0_i32, %c0_i32_0 : i32, i32
  }
  func.func @transform_5(%arg0: i32) -> (i32, i32) {
    %c0_i32 = arith.constant 0 : i32
    %c0_i32_0 = arith.constant 0 : i32
    %c0_i32_1 = arith.constant 0 : i32
    return %c0_i32, %c0_i32_0 : i32, i32
  }
  func.func @transform_6(%arg0: i32) -> (i32, i32) {
    %c0_i32 = arith.constant 0 : i32
    %c0_i32_0 = arith.constant 0 : i32
    %c0_i32_1 = arith.constant 0 : i32
    return %c0_i32, %c0_i32_0 : i32, i32
  }
  func.func @transform_7(%arg0: i32) -> (i32, i32) {
    %c0_i32 = arith.constant 0 : i32
    %c0_i32_0 = arith.constant 0 : i32
    return %arg0, %c0_i32 : i32, i32
  }
}

module attributes {stable_mosaic.version = 11 : i64} {
  func.func @mlp_kernel(%arg0: i32, %arg1: memref<16x784xf32, #tpu.memory_space<vmem>>, %arg2: memref<784x512xbf16, #tpu.memory_space<vmem>>, %arg3: memref<1x512xf32, #tpu.memory_space<vmem>>, %arg4: memref<512x128xbf16, #tpu.memory_space<vmem>>, %arg5: memref<1x128xf32, #tpu.memory_space<vmem>>, %arg6: memref<128x128xbf16, #tpu.memory_space<vmem>>, %arg7: memref<1x128xf32, #tpu.memory_space<vmem>>, %arg8: memref<16x128xf32, #tpu.memory_space<vmem>>) attributes {dimension_semantics = [#tpu.dimension_semantics<parallel>], iteration_bounds = array<i64: 1>, scalar_prefetch = 0 : i64, scratch_operands = 0 : i64, tpu.core_type = #tpu.core_type<tc>, window_params = [{transform_indices = @transform_0, window_bounds = array<i64: 16, 784>}, {pipeline_mode = #tpu.pipeline_mode<synchronous>, transform_indices = @transform_1, window_bounds = array<i64: 784, 512>}, {pipeline_mode = #tpu.pipeline_mode<synchronous>, transform_indices = @transform_2, window_bounds = array<i64: 1, 512>}, {pipeline_mode = #tpu.pipeline_mode<synchronous>, transform_indices = @transform_3, window_bounds = array<i64: 512, 128>}, {pipeline_mode = #tpu.pipeline_mode<synchronous>, transform_indices = @transform_4, window_bounds = array<i64: 1, 128>}, {pipeline_mode = #tpu.pipeline_mode<synchronous>, transform_indices = @transform_5, window_bounds = array<i64: 128, 128>}, {pipeline_mode = #tpu.pipeline_mode<synchronous>, transform_indices = @transform_6, window_bounds = array<i64: 1, 128>}, {transform_indices = @transform_7, window_bounds = array<i64: 16, 128>}]} {
    %c0 = arith.constant 0 : index
    %c0_0 = arith.constant 0 : index
    %0 = vector.load %arg1[%c0, %c0_0] : memref<16x784xf32, #tpu.memory_space<vmem>>, vector<16x784xf32>
    %1 = arith.truncf %0 : vector<16x784xf32> to vector<16x784xbf16>
    %c0_1 = arith.constant 0 : index
    %c0_2 = arith.constant 0 : index
    %2 = vector.load %arg2[%c0_1, %c0_2] : memref<784x512xbf16, #tpu.memory_space<vmem>>, vector<784x512xbf16>
    %cst = arith.constant dense<0.000000e+00> : vector<16x512xf32>
    %3 = tpu.matmul %1, %2, %cst {dimension_numbers = #tpu.dot_dimension_numbers<[1], [0], [0], [1], [0, 0, 1, 1], [], []>} : vector<16x784xbf16>, vector<784x512xbf16>, vector<16x512xf32> -> vector<16x512xf32>
    %c0_3 = arith.constant 0 : index
    %c0_4 = arith.constant 0 : index
    %4 = vector.load %arg3[%c0_3, %c0_4] : memref<1x512xf32, #tpu.memory_space<vmem>>, vector<1x512xf32>
    %5 = vector.broadcast %4 : vector<1x512xf32> to vector<16x512xf32>
    %6 = arith.addf %3, %5 : vector<16x512xf32>
    %7 = arith.truncf %6 : vector<16x512xf32> to vector<16x512xbf16>
    %8 = arith.negf %7 : vector<16x512xbf16>
    %9 = math.exp %8 : vector<16x512xbf16>
    %cst_5 = arith.constant 1.000000e+00 : bf16
    %10 = vector.broadcast %cst_5 : bf16 to vector<16x512xbf16>
    %11 = arith.addf %10, %9 : vector<16x512xbf16>
    %12 = arith.divf %10, %11 : vector<16x512xbf16>
    %c0_6 = arith.constant 0 : index
    %c0_7 = arith.constant 0 : index
    %13 = vector.load %arg4[%c0_6, %c0_7] : memref<512x128xbf16, #tpu.memory_space<vmem>>, vector<512x128xbf16>
    %cst_8 = arith.constant dense<0.000000e+00> : vector<16x128xf32>
    %14 = tpu.matmul %12, %13, %cst_8 {dimension_numbers = #tpu.dot_dimension_numbers<[1], [0], [0], [1], [0, 0, 1, 1], [], []>} : vector<16x512xbf16>, vector<512x128xbf16>, vector<16x128xf32> -> vector<16x128xf32>
    %c0_9 = arith.constant 0 : index
    %c0_10 = arith.constant 0 : index
    %15 = vector.load %arg5[%c0_9, %c0_10] : memref<1x128xf32, #tpu.memory_space<vmem>>, vector<1x128xf32>
    %16 = vector.broadcast %15 : vector<1x128xf32> to vector<16x128xf32>
    %17 = arith.addf %14, %16 : vector<16x128xf32>
    %18 = arith.truncf %17 : vector<16x128xf32> to vector<16x128xbf16>
    %19 = arith.negf %18 : vector<16x128xbf16>
    %20 = math.exp %19 : vector<16x128xbf16>
    %cst_11 = arith.constant 1.000000e+00 : bf16
    %21 = vector.broadcast %cst_11 : bf16 to vector<16x128xbf16>
    %22 = arith.addf %21, %20 : vector<16x128xbf16>
    %23 = arith.divf %21, %22 : vector<16x128xbf16>
    %c0_12 = arith.constant 0 : index
    %c0_13 = arith.constant 0 : index
    %24 = vector.load %arg6[%c0_12, %c0_13] : memref<128x128xbf16, #tpu.memory_space<vmem>>, vector<128x128xbf16>
    %cst_14 = arith.constant dense<0.000000e+00> : vector<16x128xf32>
    %25 = tpu.matmul %23, %24, %cst_14 {dimension_numbers = #tpu.dot_dimension_numbers<[1], [0], [0], [1], [0, 0, 1, 1], [], []>} : vector<16x128xbf16>, vector<128x128xbf16>, vector<16x128xf32> -> vector<16x128xf32>
    %c0_15 = arith.constant 0 : index
    %c0_16 = arith.constant 0 : index
    %26 = vector.load %arg7[%c0_15, %c0_16] : memref<1x128xf32, #tpu.memory_space<vmem>>, vector<1x128xf32>
    %27 = vector.broadcast %26 : vector<1x128xf32> to vector<16x128xf32>
    %28 = arith.addf %25, %27 : vector<16x128xf32>
    %cst_17 = arith.constant dense<0xFF800000> : vector<16xf32>
    %29 = vector.multi_reduction <maximumf>, %28, %cst_17 [1] : vector<16x128xf32> to vector<16xf32>
    %30 = vector.shape_cast %29 : vector<16xf32> to vector<16x1xf32>
    %31 = vector.broadcast %30 : vector<16x1xf32> to vector<16x128xf32>
    %32 = arith.subf %28, %31 : vector<16x128xf32>
    %33 = math.exp %32 : vector<16x128xf32>
    %cst_18 = arith.constant dense<0.000000e+00> : vector<16xf32>
    %34 = vector.multi_reduction <add>, %33, %cst_18 [1] : vector<16x128xf32> to vector<16xf32>
    %35 = vector.shape_cast %34 : vector<16xf32> to vector<16x1xf32>
    %36 = math.log %35 : vector<16x1xf32>
    %37 = vector.broadcast %36 : vector<16x1xf32> to vector<16x128xf32>
    %38 = arith.subf %32, %37 : vector<16x128xf32>
    %c0_19 = arith.constant 0 : index
    %c0_20 = arith.constant 0 : index
    %39 = vector.load %arg8[%c0_19, %c0_20] : memref<16x128xf32, #tpu.memory_space<vmem>>, vector<16x128xf32>
    tpu.vector_store %arg8[%c0_19, %c0_20], %38 {strides = array<i32>} : memref<16x128xf32, #tpu.memory_space<vmem>>, vector<16x128xf32>,
    return
  }
  func.func @transform_0(%arg0: i32) -> (i32, i32) {
    %c0_i32 = arith.constant 0 : i32
    %c0_i32_0 = arith.constant 0 : i32
    return %arg0, %c0_i32 : i32, i32
  }
  func.func @transform_1(%arg0: i32) -> (i32, i32) {
    %c0_i32 = arith.constant 0 : i32
    %c0_i32_0 = arith.constant 0 : i32
    %c0_i32_1 = arith.constant 0 : i32
    return %c0_i32, %c0_i32_0 : i32, i32
  }
  func.func @transform_2(%arg0: i32) -> (i32, i32) {
    %c0_i32 = arith.constant 0 : i32
    %c0_i32_0 = arith.constant 0 : i32
    %c0_i32_1 = arith.constant 0 : i32
    return %c0_i32, %c0_i32_0 : i32, i32
  }
  func.func @transform_3(%arg0: i32) -> (i32, i32) {
    %c0_i32 = arith.constant 0 : i32
    %c0_i32_0 = arith.constant 0 : i32
    %c0_i32_1 = arith.constant 0 : i32
    return %c0_i32, %c0_i32_0 : i32, i32
  }
  func.func @transform_4(%arg0: i32) -> (i32, i32) {
    %c0_i32 = arith.constant 0 : i32
    %c0_i32_0 = arith.constant 0 : i32
    %c0_i32_1 = arith.constant 0 : i32
    return %c0_i32, %c0_i32_0 : i32, i32
  }
  func.func @transform_5(%arg0: i32) -> (i32, i32) {
    %c0_i32 = arith.constant 0 : i32
    %c0_i32_0 = arith.constant 0 : i32
    %c0_i32_1 = arith.constant 0 : i32
    return %c0_i32, %c0_i32_0 : i32, i32
  }
  func.func @transform_6(%arg0: i32) -> (i32, i32) {
    %c0_i32 = arith.constant 0 : i32
    %c0_i32_0 = arith.constant 0 : i32
    %c0_i32_1 = arith.constant 0 : i32
    return %c0_i32, %c0_i32_0 : i32, i32
  }
  func.func @transform_7(%arg0: i32) -> (i32, i32) {
    %c0_i32 = arith.constant 0 : i32
    %c0_i32_0 = arith.constant 0 : i32
    return %arg0, %c0_i32 : i32, i32
  }
}

</mosaic_0001>

<bundles_post_ra>
// kernel: tpu_custom_call.1
= control target key start
LH: loop header
LB: loop body
LE: loop exit
PB: predicated region body
PF: predicated region fallthrough
CT: control target
= control target key end

     0   :  { %12 = vsyncpa [#allocation3], 0  ;;  %s3156_s0 = inlined_call_operand.hbm [shape: f32[16,784], index: 0, kind: input, shape index: {}]   ;;  %s3157_s1 = inlined_call_operand.hbm [shape: bf16[784,512], index: 1, kind: input, shape index: {}]   ;;  %s3158_s2 = inlined_call_operand.hbm [shape: f32[1,512], index: 2, kind: input, shape index: {}]   ;;  %s3159_s3 = inlined_call_operand.hbm [shape: bf16[512,128], index: 3, kind: input, shape index: {}]   ;;  %s3160_s4 = inlined_call_operand.vmem [shape: f32[1,128], index: 4, kind: input, shape index: {}]   ;;  %s3161_s5 = inlined_call_operand.hbm [shape: bf16[128,128], index: 5, kind: input, shape index: {}]   ;;  %s3162_s6 = inlined_call_operand.vmem [shape: f32[1,128], index: 6, kind: input, shape index: {}]   ;;  %s3163_s7 = inlined_call_operand.hbm [shape: f32[16,128], index: 7, kind: output, shape index: {}]  }
   0x1   :  { %13 = vsyncpa [#allocation6], 0 }
   0x2   :  { %14 = vsyncpa [#allocation9], 0 }
   0x3   :  { %15 = vsyncpa [#allocation4], 0  ;;  %s3025_s24 = smov [#allocation5]  }
   0x4   :  { %s33_s25 = sshll.u32 %s3025_s24, 4  ;;  %s34_s25 = int_to_ptr.vmem [resolvable:$true] %s33_s25 }
   0x5   :  { %s2905_s26 = scalar_lea.vmem %s34_s25, 25088  ;;  %p2910_p1 = scmp.lt.s32.totalorder %s34_s25, %s34_s25 }
   0x6   :  { %p2906_p0 = scmp.ne.s32.totalorder %s34_s25, %s2905_s26  ;;  %p2911_p2 = scmp.lt.s32.totalorder %s2905_s26, %s2905_s26 }
   0x8   :  { %p2912_p3 = por %p2911_p2, %p2910_p1 }
   0xa   :  { %p2913_p4 = pnand %p2912_p3, %p2906_p0 }
   0xc   :  { %2916 = shalt.err (!%p2913_p4)
}
   0xd   :  { %s3026_s27 = smov 256   ;;  %s3027_s28 = smov 16  }
   0xe   :  { %39 = dma.hbm_to_vmem [thread:$0]  %s3157_s1, 25088, %s34_s25, [#allocation6], %s3026_s27, %s3026_s27, %s3027_s28  }
   0xf   :  { %s3028_s8 = smov [#allocation8]  }
  0x10   :  { %s55_s9 = sshll.u32 %s3028_s8, 4  ;;  %s56_s9 = int_to_ptr.vmem [resolvable:$true] %s55_s9 }
  0x11   :  { %s2925_s10 = scalar_lea.vmem %s56_s9, 4096  ;;  %p2930_p6 = scmp.lt.s32.totalorder %s56_s9, %s56_s9 }
  0x12   :  { %p2926_p5 = scmp.ne.s32.totalorder %s56_s9, %s2925_s10  ;;  %p2931_p7 = scmp.lt.s32.totalorder %s2925_s10, %s2925_s10 }
  0x14   :  { %p2932_p8 = por %p2931_p7, %p2930_p6 }
  0x16   :  { %p2933_p9 = pnand %p2932_p8, %p2926_p5 }
  0x18   :  { %2936 = shalt.err (!%p2933_p9)
}
  0x19   :  { %s3029_s11 = smov 64   ;;  %s3030_s12 = smov 4  }
  0x1a   :  { %61 = dma.hbm_to_vmem [thread:$0]  %s3159_s3, 4096, %s56_s9, [#allocation9], %s3029_s11, %s3029_s11, %s3030_s12  }
  0x1b   :  { %s3031_s1 = smov [#allocation2]  }
  0x1c   :  { %s21_s15 = sshll.u32 %s3031_s1, 4  ;;  %s22_s15 = int_to_ptr.vmem [resolvable:$true] %s21_s15 }
  0x1d   :  { %s2945_s16 = scalar_lea.vmem %s22_s15, 1792  ;;  %p2950_p11 = scmp.lt.s32.totalorder %s22_s15, %s22_s15 }
  0x1e   :  { %p2946_p10 = scmp.ne.s32.totalorder %s22_s15, %s2945_s16  ;;  %p2951_p12 = scmp.lt.s32.totalorder %s2945_s16, %s2945_s16 }
  0x20   :  { %p2952_p13 = por %p2951_p12, %p2950_p11 }
  0x22   :  { %p2953_p0 = pnand %p2952_p13, %p2946_p10 }
  0x24   :  { %2956 = shalt.err (!%p2953_p0)
}
  0x25   :  { %s3032_s17 = smov 896   ;;  %s3033_s18 = smov 56  }
  0x26   :  { %27 = dma.hbm_to_vmem [thread:$0]  %s3156_s0, 1792, %s22_s15, [#allocation3], %s3032_s17, %s3032_s17, %s3033_s18  }
  0x27   :  { %s3034_s21 = smov [#allocation7]   ;;  %s3035_s3 = smov [#allocation10]  }
  0x28   :  { %s46_s22 = sshll.u32 %s3034_s21, 4  ;;  %s69_s23 = sshll.u32 %s3035_s3, 4  ;;  %s47_s22 = int_to_ptr.vmem [resolvable:$true] %s46_s22  ;;  %s70_s23 = int_to_ptr.vmem [resolvable:$true] %s69_s23 }
  0x29   :  { %s2965_s24 = scalar_lea.vmem %s47_s22, 64  ;;  %p2970_p2 = scmp.lt.s32.totalorder %s47_s22, %s47_s22 }
  0x2a   :  { %p2966_p1 = scmp.ne.s32.totalorder %s47_s22, %s2965_s24  ;;  %p2971_p3 = scmp.lt.s32.totalorder %s2965_s24, %s2965_s24 }
  0x2c   :  { %p2972_p4 = por %p2971_p3, %p2970_p2 }
  0x2e   :  { %p2973_p5 = pnand %p2972_p4, %p2966_p1 }
  0x30   :  { %2976 = shalt.err (!%p2973_p5)
}
  0x31   :  { %49 = dma.hbm_to_vmem [thread:$0]  %s3158_s2, 64, %s47_s22, [#allocation6]  }
  0x32   :  { %s2985_s27 = scalar_lea.vmem %s70_s23, 1024  ;;  %p2990_p7 = scmp.lt.s32.totalorder %s70_s23, %s70_s23 }
  0x33   :  { %p2986_p6 = scmp.ne.s32.totalorder %s70_s23, %s2985_s27  ;;  %p2991_p8 = scmp.lt.s32.totalorder %s2985_s27, %s2985_s27 }
  0x35   :  { %p2992_p9 = por %p2991_p8, %p2990_p7 }
  0x37   :  { %p2993_p10 = pnand %p2992_p9, %p2986_p6 }
  0x39   :  { %2996 = shalt.err (!%p2993_p10)
}
  0x3a   :  { %75 = dma.hbm_to_vmem [thread:$0]  %s3161_s5, 1024, %s70_s23, [#allocation9], %s3029_s11, %s3029_s11, %s3030_s12  }
  0x3b   :  { %3017 = dma.done.wait [#allocation3], 1792  }
  0x3c   :  { %3018 = vsyncadd [#allocation3], 4294965504 }
  0x3d   :  { %3019 = dma.done.wait [#allocation6], 25152  }
  0x3e   :  { %3020 = vsyncadd [#allocation6], 4294942144 }
  0x3f   :  { %3021 = dma.done.wait [#allocation9], 5120  }
  0x40   :  { %3022 = vsyncadd [#allocation9], 4294962176  ;;  %v2535_v0 = vld [vmem:[#allocation5 + $0xe4] ss:$16 sps:$4 sm:$0xff]   ;;  %v2539_v2 = vld [vmem:[#allocation5 + $0xe0] ss:$16 sps:$4 sm:$0xff]  }
  0x41   :  { %v2537_v1 = vld [vmem:[#allocation5 + $0x2e4] ss:$16 sps:$4 sm:$0xff]   ;;  %1318 = vmatprep.subr.bf16.mxu0 %v2535_v0  ;;  %v2540_v3 = vld [vmem:[#allocation5 + $0x2e0] ss:$16 sps:$4 sm:$0xff]   ;;  %v96_v46 = vld [vmem:[#allocation2 + $0x8] sm:$0xff]  ;;  %vm1314_vm0 = vcmask 130048  }
  0x42   :  { %1361 = vmatprep.subr.bf16.mxu1 %v2537_v1  ;;  %v2541_v4 = vld [vmem:[#allocation5 + $0xc4] ss:$16 sps:$4 sm:$0xff]   ;;  %1319 = vmatpush1.bf16.msra.mxu0 %v2539_v2  ;;  %v2545_v6 = vld [vmem:[#allocation5 + $0xc0] ss:$16 sps:$4 sm:$0xff]   ;;  %v98_v48 = vld [vmem:[#allocation2 + $0x18] sm:$0xff]  ;;  %vm3038_vm1 = vmmov 0  }
  0x43   :  { %1362 = vmatpush1.bf16.msra.mxu1 %v2540_v3  ;;  %v2543_v5 = vld [vmem:[#allocation5 + $0x2c4] ss:$16 sps:$4 sm:$0xff]   ;;  %1320 = vmatprep.subr.bf16.mxu0 %v2541_v4  ;;  %v2546_v7 = vld [vmem:[#allocation5 + $0x2c0] ss:$16 sps:$4 sm:$0xff]  }
  0x44   :  { %1363 = vmatprep.subr.bf16.mxu1 %v2543_v5  ;;  %v2547_v8 = vld [vmem:[#allocation5 + $0xa4] ss:$16 sps:$4 sm:$0xff]   ;;  %v2551_v10 = vld [vmem:[#allocation5 + $0xa0] ss:$16 sps:$4 sm:$0xff]  }
  0x45   :  { %v2549_v9 = vld [vmem:[#allocation5 + $0x2a4] ss:$16 sps:$4 sm:$0xff]   ;;  %v2552_v11 = vld [vmem:[#allocation5 + $0x2a0] ss:$16 sps:$4 sm:$0xff]  }
  0x46   :  { %1321 = vmatpush1.bf16.msra.mxu0 %v2545_v6  ;;  %v2553_v12 = vld [vmem:[#allocation5 + $0x84] ss:$16 sps:$4 sm:$0xff]   ;;  %v2557_v14 = vld [vmem:[#allocation5 + $0x80] ss:$16 sps:$4 sm:$0xff]  }
  0x47   :  { %1364 = vmatpush1.bf16.msra.mxu1 %v2546_v7  ;;  %1322 = vmatprep.subr.bf16.mxu0 %v2547_v8  ;;  %v2555_v13 = vld [vmem:[#allocation5 + $0x284] ss:$16 sps:$4 sm:$0xff]   ;;  %v2558_v15 = vld [vmem:[#allocation5 + $0x280] ss:$16 sps:$4 sm:$0xff]   ;;  %v102_v7 = vld [vmem:[#allocation2 + $0x38] sm:$0xff] }
  0x48   :  { %1365 = vmatprep.subr.bf16.mxu1 %v2549_v9  ;;  %v2559_v16 = vld [vmem:[#allocation5 + $0x64] ss:$16 sps:$4 sm:$0xff]   ;;  %v2563_v18 = vld [vmem:[#allocation5 + $0x60] ss:$16 sps:$4 sm:$0xff]   ;;  %v104_v9 = vld [vmem:[#allocation2 + $0x48] sm:$0xff] }
  0x49   :  { %v2561_v17 = vld [vmem:[#allocation5 + $0x264] ss:$16 sps:$4 sm:$0xff]   ;;  %v2564_v19 = vld [vmem:[#allocation5 + $0x260] ss:$16 sps:$4 sm:$0xff]  }
  0x4a   :  { %1323 = vmatpush1.bf16.msra.mxu0 %v2551_v10  ;;  %v2565_v20 = vld [vmem:[#allocation5 + $0x44] ss:$16 sps:$4 sm:$0xff]   ;;  %v2569_v22 = vld [vmem:[#allocation5 + $0x40] ss:$16 sps:$4 sm:$0xff]  }
  0x4b   :  { %1366 = vmatpush1.bf16.msra.mxu1 %v2552_v11  ;;  %1324 = vmatprep.subr.bf16.mxu0 %v2553_v12  ;;  %v2567_v21 = vld [vmem:[#allocation5 + $0x244] ss:$16 sps:$4 sm:$0xff]   ;;  %v2570_v23 = vld [vmem:[#allocation5 + $0x240] ss:$16 sps:$4 sm:$0xff]  }
  0x4c   :  { %1367 = vmatprep.subr.bf16.mxu1 %v2555_v13  ;;  %v2571_v24 = vld [vmem:[#allocation5 + $0x24] ss:$16 sps:$4 sm:$0xff]   ;;  %v2575_v26 = vld [vmem:[#allocation5 + $0x20] ss:$16 sps:$4 sm:$0xff]  }
  0x4d   :  { %v2573_v25 = vld [vmem:[#allocation5 + $0x224] ss:$16 sps:$4 sm:$0xff]   ;;  %v2576_v27 = vld [vmem:[#allocation5 + $0x220] ss:$16 sps:$4 sm:$0xff]  }
  0x4e   :  { %1325 = vmatpush1.bf16.msra.mxu0 %v2557_v14  ;;  %v2577_v28 = vld [vmem:[#allocation5 + $0x4] ss:$16 sps:$4 sm:$0xff]   ;;  %v2581_v30 = vld [vmem:[#allocation5] ss:$16 sps:$4 sm:$0xff]  }
  0x4f   :  { %1368 = vmatpush1.bf16.msra.mxu1 %v2558_v15  ;;  %1326 = vmatprep.subr.bf16.mxu0 %v2559_v16  ;;  %v2579_v29 = vld [vmem:[#allocation5 + $0x204] ss:$16 sps:$4 sm:$0xff]   ;;  %v2582_v31 = vld [vmem:[#allocation5 + $0x200] ss:$16 sps:$4 sm:$0xff]  }
  0x50   :  { %1369 = vmatprep.subr.bf16.mxu1 %v2561_v17  ;;  %v2583_v32 = vld [vmem:[#allocation5 + $0x1e4] ss:$16 sps:$4 sm:$0xff]   ;;  %v2587_v34 = vld [vmem:[#allocation5 + $0x1e0] ss:$16 sps:$4 sm:$0xff]   ;;  %v2642_v17 = vld [vmem:[#allocation5 + $0xec] ss:$16 sps:$4 sm:$0xff]  }
  0x51   :  { %v2585_v33 = vld [vmem:[#allocation5 + $0x3e4] ss:$16 sps:$4 sm:$0xff]   ;;  %v2588_v35 = vld [vmem:[#allocation5 + $0x3e0] ss:$16 sps:$4 sm:$0xff]  }
  0x52   :  { %1327 = vmatpush1.bf16.msra.mxu0 %v2563_v18  ;;  %v2589_v36 = vld [vmem:[#allocation5 + $0x1c4] ss:$16 sps:$4 sm:$0xff]   ;;  %v2593_v38 = vld [vmem:[#allocation5 + $0x1c0] ss:$16 sps:$4 sm:$0xff]  }
  0x53   :  { %1370 = vmatpush1.bf16.msra.mxu1 %v2564_v19  ;;  %1328 = vmatprep.subr.bf16.mxu0 %v2565_v20  ;;  %v2591_v37 = vld [vmem:[#allocation5 + $0x3c4] ss:$16 sps:$4 sm:$0xff]   ;;  %v2594_v39 = vld [vmem:[#allocation5 + $0x3c0] ss:$16 sps:$4 sm:$0xff]   ;;  %v108_v20 = vld [vmem:[#allocation2 + $0x68] sm:$0xff] }
  0x54   :  { %1371 = vmatprep.subr.bf16.mxu1 %v2567_v21  ;;  %v2595_v40 = vld [vmem:[#allocation5 + $0x1a4] ss:$16 sps:$4 sm:$0xff]   ;;  %v2599_v42 = vld [vmem:[#allocation5 + $0x1a0] ss:$16 sps:$4 sm:$0xff]   ;;  %v3036_v21 = vmov 0  }
  0x55   :  { %v2597_v41 = vld [vmem:[#allocation5 + $0x3a4] ss:$16 sps:$4 sm:$0xff]   ;;  %v2600_v43 = vld [vmem:[#allocation5 + $0x3a0] ss:$16 sps:$4 sm:$0xff]  }
  0x56   :  { %1329 = vmatpush1.bf16.msra.mxu0 %v2569_v22  ;;  %v2601_v44 = vld [vmem:[#allocation5 + $0x184] ss:$16 sps:$4 sm:$0xff]   ;;  %v2605_v50 = vld [vmem:[#allocation5 + $0x180] ss:$16 sps:$4 sm:$0xff]  }
  0x57   :  { %1372 = vmatpush1.bf16.msra.mxu1 %v2570_v23  ;;  %1330 = vmatprep.subr.bf16.mxu0 %v2571_v24  ;;  %v2603_v45 = vld [vmem:[#allocation5 + $0x384] ss:$16 sps:$4 sm:$0xff]   ;;  %v2606_v51 = vld [vmem:[#allocation5 + $0x380] ss:$16 sps:$4 sm:$0xff]   ;;  %v2640_v24 = vld [vmem:[#allocation5 + $0xe8] ss:$16 sps:$4 sm:$0xff]  }
  0x58   :  { %1373 = vmatprep.subr.bf16.mxu1 %v2573_v25  ;;  %v103_v47 = vld [vmem:[#allocation2 + $0x40] sm:$0xff]  ;;  %v105_v49 = vld [vmem:[#allocation2 + $0x50] sm:$0xff] }
  0x59   :  { %v2607_v52 = vld [vmem:[#allocation5 + $0x164] ss:$16 sps:$4 sm:$0xff]   ;;  %v3103_v53 = vpack.c.bf16 %v103_v47, %v96_v46  ;;  %v3105_v54 = vpack.c.bf16 %v105_v49, %v98_v48  ;;  %v2611_v56 = vld [vmem:[#allocation5 + $0x160] ss:$16 sps:$4 sm:$0xff]   ;;  %v2670_v47 = vld [vmem:[#allocation5 + $0x48] ss:$16 sps:$4 sm:$0xff]  }
  0x5a   :  { %1331 = vmatpush1.bf16.msra.mxu0 %v2575_v26  ;;  %v2609_v55 = vld [vmem:[#allocation5 + $0x364] ss:$16 sps:$4 sm:$0xff]   ;;  %v2612_v57 = vld [vmem:[#allocation5 + $0x360] ss:$16 sps:$4 sm:$0xff]   ;;  %v2648_v26 = vld [vmem:[#allocation5 + $0xcc] ss:$16 sps:$4 sm:$0xff]  }
  0x5b   :  { %1374 = vmatpush1.bf16.msra.mxu1 %v2576_v27  ;;  %1332 = vmatprep.subr.bf16.mxu0 %v2577_v28  ;;  %v2613_v58 = vld [vmem:[#allocation5 + $0x144] ss:$16 sps:$4 sm:$0xff]   ;;  %v2617_v60 = vld [vmem:[#allocation5 + $0x140] ss:$16 sps:$4 sm:$0xff]   ;;  %v2646_v28 = vld [vmem:[#allocation5 + $0xc8] ss:$16 sps:$4 sm:$0xff]  }
  0x5c   :  { %1375 = vmatprep.subr.bf16.mxu1 %v2579_v29  ;;  %1350 = vmatprep.mubr.bf16.mxu0 %v3103_v53  ;;  %v2615_v59 = vld [vmem:[#allocation5 + $0x344] ss:$16 sps:$4 sm:$0xff]   ;;  %v2618_v61 = vld [vmem:[#allocation5 + $0x340] ss:$16 sps:$4 sm:$0xff]   ;;  %v2678_v49 = vld [vmem:[#allocation5 + $0x2c] ss:$16 sps:$4 sm:$0xff]  }
  0x5d   :  { %1393 = vmatprep.mubr.bf16.mxu1 %v3105_v54  ;;  %v2619_v62 = vld [vmem:[#allocation5 + $0x124] ss:$16 sps:$4 sm:$0xff]   ;;  %v2623_v0 = vld [vmem:[#allocation5 + $0x120] ss:$16 sps:$4 sm:$0xff]  }
  0x5e   :  { %1333 = vmatpush1.bf16.msra.mxu0 %v2581_v30  ;;  %v2621_v63 = vld [vmem:[#allocation5 + $0x324] ss:$16 sps:$4 sm:$0xff]   ;;  %v2624_v1 = vld [vmem:[#allocation5 + $0x320] ss:$16 sps:$4 sm:$0xff]   ;;  %v2654_v30 = vld [vmem:[#allocation5 + $0xac] ss:$16 sps:$4 sm:$0xff]  }
  0x5f   :  { %1376 = vmatpush1.bf16.msra.mxu1 %v2582_v31  ;;  %1334 = vmatprep.subr.bf16.mxu0 %v2583_v32  ;;  %v2625_v2 = vld [vmem:[#allocation5 + $0x104] ss:$16 sps:$4 sm:$0xff]   ;;  %v2629_v4 = vld [vmem:[#allocation5 + $0x100] ss:$16 sps:$4 sm:$0xff]   ;;  %v2652_v32 = vld [vmem:[#allocation5 + $0xa8] ss:$16 sps:$4 sm:$0xff]  }
  0x60   :  { %1377 = vmatprep.subr.bf16.mxu1 %v2585_v33  ;;  %v2627_v3 = vld [vmem:[#allocation5 + $0x304] ss:$16 sps:$4 sm:$0xff]   ;;  %v2630_v5 = vld [vmem:[#allocation5 + $0x300] ss:$16 sps:$4 sm:$0xff]  }
  0x61   :  { %v95_v6 = vld [vmem:[#allocation2] sm:$0xff]  ;;  %v97_v8 = vld [vmem:[#allocation2 + $0x10] sm:$0xff] }
  0x62   :  { %1335 = vmatpush2.bf16.msra.mxu0 %v2587_v34  ;;  %v2633_v10 = vld [vmem:[#allocation5 + $0x4e4] ss:$16 sps:$4 sm:$0xff]   ;;  %v3109_v12 = vpack.c.bf16 %v102_v7, %v95_v6  ;;  %v3111_v13 = vpack.c.bf16 %v104_v9, %v97_v8  ;;  %v2631_v14 = vld [vmem:[#allocation5 + $0x4e0] ss:$16 sps:$4 sm:$0xff]   ;;  %v2660_v34 = vld [vmem:[#allocation5 + $0x8c] ss:$16 sps:$4 sm:$0xff]  }
  0x63   :  { %1378 = vmatpush2.bf16.msra.mxu1 %v2588_v35  ;;  %1336 = vmatprep.subr.bf16.mxu0 %v2589_v36  ;;  %v2636_v11 = vld [vmem:[#allocation5 + $0x604] ss:$16 sps:$4 sm:$0xff]   ;;  %v2634_v15 = vld [vmem:[#allocation5 + $0x600] ss:$16 sps:$4 sm:$0xff]   ;;  %v2658_v36 = vld [vmem:[#allocation5 + $0x88] ss:$16 sps:$4 sm:$0xff]  }
  0x64   :  { %1379 = vmatprep.subr.bf16.mxu1 %v2591_v37  ;;  %v2639_v16 = vld [vmem:[#allocation5 + $0x4c4] ss:$16 sps:$4 sm:$0xff]   ;;  %v2637_v18 = vld [vmem:[#allocation5 + $0x4c0] ss:$16 sps:$4 sm:$0xff]   ;;  %v2708_v6 = vld [vmem:[#allocation5 + $0x18c] ss:$16 sps:$4 sm:$0xff]  }
  0x65   :  { %v101_v19 = vld [vmem:[#allocation2 + $0x30] sm:$0xff]  ;;  %v2706_v8 = vld [vmem:[#allocation5 + $0x188] ss:$16 sps:$4 sm:$0xff]  }
  0x66   :  { %1337 = vmatpush2.bf16.msra.mxu0 %v2593_v38  ;;  %v2645_v22 = vld [vmem:[#allocation5 + $0x4a4] ss:$16 sps:$4 sm:$0xff]   ;;  %v3116_v23 = vpack.c.bf16 %v108_v20, %v101_v19  ;;  %v2643_v25 = vld [vmem:[#allocation5 + $0x4a0] ss:$16 sps:$4 sm:$0xff]   ;;  %v2666_v38 = vld [vmem:[#allocation5 + $0x6c] ss:$16 sps:$4 sm:$0xff]  }
  0x67   :  { %1380 = vmatpush2.bf16.msra.mxu1 %v2594_v39  ;;  %1338 = vmatprep.subr.bf16.mxu0 %v2595_v40  ;;  %v2651_v27 = vld [vmem:[#allocation5 + $0x484] ss:$16 sps:$4 sm:$0xff]   ;;  %v2649_v29 = vld [vmem:[#allocation5 + $0x480] ss:$16 sps:$4 sm:$0xff]   ;;  %v2664_v40 = vld [vmem:[#allocation5 + $0x68] ss:$16 sps:$4 sm:$0xff]  }
  0x68   :  { %1381 = vmatprep.subr.bf16.mxu1 %v2597_v41  ;;  %v2657_v31 = vld [vmem:[#allocation5 + $0x464] ss:$16 sps:$4 sm:$0xff]   ;;  %v2655_v33 = vld [vmem:[#allocation5 + $0x460] ss:$16 sps:$4 sm:$0xff]   ;;  %v100_v41 = vld [vmem:[#allocation2 + $0x28] sm:$0xff] }
  0x69   :  { %v2663_v35 = vld [vmem:[#allocation5 + $0x444] ss:$16 sps:$4 sm:$0xff]   ;;  %v2661_v37 = vld [vmem:[#allocation5 + $0x440] ss:$16 sps:$4 sm:$0xff]  }
  0x6a   :  { %1339 = vmatpush2.bf16.msra.mxu0 %v2599_v42  ;;  %v2669_v39 = vld [vmem:[#allocation5 + $0x424] ss:$16 sps:$4 sm:$0xff]   ;;  %v2673_v48 = vld [vmem:[#allocation5 + $0x400] ss:$16 sps:$4 sm:$0xff]  }
  0x6b   :  { %1382 = vmatpush2.bf16.msra.mxu1 %v2600_v43  ;;  %1340 = vmatprep.subr.bf16.mxu0 %v2601_v44  ;;  %v107_v42 = vld [vmem:[#allocation2 + $0x60] sm:$0xff] }
  0x6c   :  { %1383 = vmatprep.subr.bf16.mxu1 %v2603_v45  ;;  %v2667_v43 = vld [vmem:[#allocation5 + $0x420] ss:$16 sps:$4 sm:$0xff]   ;;  %v3121_v44 = vpack.c.bf16 %v107_v42, %v100_v41  ;;  %v2672_v45 = vld [vmem:[#allocation5 + $0x4c] ss:$16 sps:$4 sm:$0xff]   ;;  %v2675_v46 = vld [vmem:[#allocation5 + $0x404] ss:$16 sps:$4 sm:$0xff]  }
  0x6d   :  { %v2711_v7 = vld [vmem:[#allocation5 + $0x544] ss:$16 sps:$4 sm:$0xff]   ;;  %v2709_v9 = vld [vmem:[#allocation5 + $0x540] ss:$16 sps:$4 sm:$0xff]   ;;  %v2750_v41 = vld [vmem:[#allocation5 + $0x4ac] ss:$16 sps:$4 sm:$0xff]  }
  0x6e   :  { %1341 = vmatpush2.bf16.msra.mxu0 %v2605_v50  ;;  %v2681_v50 = vld [vmem:[#allocation5 + $0x5e4] ss:$16 sps:$4 sm:$0xff]   ;;  %v2721_v19 = vld [vmem:[#allocation5 + $0x500] ss:$16 sps:$4 sm:$0xff]   ;;  %v2753_v42 = vld [vmem:[#allocation5 + $0x26c] ss:$16 sps:$4 sm:$0xff]  }
  0x6f   :  { %1384 = vmatpush2.bf16.msra.mxu1 %v2606_v51  ;;  %1342 = vmatprep.subr.bf16.mxu0 %v2607_v52  ;;  %v2676_v51 = vld [vmem:[#allocation5 + $0x28] ss:$16 sps:$4 sm:$0xff]   ;;  %v2679_v52 = vld [vmem:[#allocation5 + $0x5e0] ss:$16 sps:$4 sm:$0xff]  }
  0x70   :  { %1385 = vmatprep.subr.bf16.mxu1 %v2609_v55  ;;  %v2687_v55 = vld [vmem:[#allocation5 + $0x5c4] ss:$16 sps:$4 sm:$0xff]  }
  0x71   :  { %v99_v20 = vld [vmem:[#allocation2 + $0x20] sm:$0xff] }
  0x72   :  { %1343 = vmatpush2.bf16.msra.mxu0 %v2611_v56  ;;  %v2682_v56 = vld [vmem:[#allocation5 + $0x8] ss:$16 sps:$4 sm:$0xff]  }
  0x73   :  { %1386 = vmatpush2.bf16.msra.mxu1 %v2612_v57  ;;  %1344 = vmatprep.subr.bf16.mxu0 %v2613_v58  ;;  %v2685_v57 = vld [vmem:[#allocation5 + $0x5c0] ss:$16 sps:$4 sm:$0xff]   ;;  %v2690_v58 = vld [vmem:[#allocation5 + $0x1ec] ss:$16 sps:$4 sm:$0xff]  }
  0x74   :  { %1387 = vmatprep.subr.bf16.mxu1 %v2615_v59  ;;  %v2693_v59 = vld [vmem:[#allocation5 + $0x5a4] ss:$16 sps:$4 sm:$0xff]  }
  0x76   :  { %1345 = vmatpush2.bf16.msra.mxu0 %v2617_v60  ;;  %v2688_v60 = vld [vmem:[#allocation5 + $0x1e8] ss:$16 sps:$4 sm:$0xff]  }
  0x77   :  { %1388 = vmatpush2.bf16.msra.mxu1 %v2618_v61  ;;  %1346 = vmatprep.subr.bf16.mxu0 %v2619_v62  ;;  %v2691_v61 = vld [vmem:[#allocation5 + $0x5a0] ss:$16 sps:$4 sm:$0xff]   ;;  %v2696_v62 = vld [vmem:[#allocation5 + $0x1cc] ss:$16 sps:$4 sm:$0xff]  }
  0x78   :  { %1389 = vmatprep.subr.bf16.mxu1 %v2621_v63  ;;  %v2699_v63 = vld [vmem:[#allocation5 + $0x584] ss:$16 sps:$4 sm:$0xff]  }
  0x7a   :  { %1347 = vmatpush2.bf16.msra.mxu0 %v2623_v0  ;;  %v2694_v0 = vld [vmem:[#allocation5 + $0x1c8] ss:$16 sps:$4 sm:$0xff]  }
  0x7b   :  { %1390 = vmatpush2.bf16.msra.mxu1 %v2624_v1  ;;  %1348 = vmatprep.subr.bf16.mxu0 %v2625_v2  ;;  %v2697_v1 = vld [vmem:[#allocation5 + $0x580] ss:$16 sps:$4 sm:$0xff]   ;;  %v2702_v2 = vld [vmem:[#allocation5 + $0x1ac] ss:$16 sps:$4 sm:$0xff]  }
  0x7c   :  { %1391 = vmatprep.subr.bf16.mxu1 %v2627_v3  ;;  %v2705_v3 = vld [vmem:[#allocation5 + $0x564] ss:$16 sps:$4 sm:$0xff]  }
  0x7e   :  { %1349 = vmatpush2.bf16.msra.mxu0 %v2629_v4  ;;  %v2700_v4 = vld [vmem:[#allocation5 + $0x1a8] ss:$16 sps:$4 sm:$0xff]  }
  0x7f   :  { %1392 = vmatpush2.bf16.msra.mxu1 %v2630_v5  ;;  %1404 = vmatprep.subr.bf16.mxu0 %v2633_v10  ;;  %v2703_v5 = vld [vmem:[#allocation5 + $0x560] ss:$16 sps:$4 sm:$0xff]   ;;  %v2714_v10 = vld [vmem:[#allocation5 + $0x16c] ss:$16 sps:$4 sm:$0xff]  }
  0x80   :  { %1461 = vmatprep.subr.bf16.mxu1 %v2636_v11  ;;  %v2717_v11 = vld [vmem:[#allocation5 + $0x524] ss:$16 sps:$4 sm:$0xff]  }
  0x81   :  { %1351 = vmatmul.mubr.bf16.vlgmr.msra.gmra.mxu0 %v3109_v12 }
  0x82   :  { %1394 = vmatmul.mubr.bf16.vlgmr.msra.gmra.mxu1 %v3111_v13  ;;  %1405 = vmatpush1.bf16.msra.mxu0 %v2631_v14  ;;  %v2712_v14 = vld [vmem:[#allocation5 + $0x168] ss:$16 sps:$4 sm:$0xff]  }
  0x83   :  { %1462 = vmatpush1.bf16.msra.mxu1 %v2634_v15  ;;  %1406 = vmatprep.subr.bf16.mxu0 %v2639_v16  ;;  %v2715_v15 = vld [vmem:[#allocation5 + $0x520] ss:$16 sps:$4 sm:$0xff]   ;;  %v2720_v16 = vld [vmem:[#allocation5 + $0x14c] ss:$16 sps:$4 sm:$0xff]  }
  0x84   :  { %1479 = vmatprep.mubr.bf16.mxu1 %v3036_v21  ;;  %1490 = vmatprep.subr.bf16.mxu1 %v2642_v17  ;;  %v2723_v17 = vld [vmem:[#allocation5 + $0x504] ss:$16 sps:$4 sm:$0xff]  }
  0x85   :  { %1436 = vmatprep.mubr.bf16.mxu0 %v3121_v44 }
  0x86   :  { %1407 = vmatpush1.bf16.msra.mxu0 %v2637_v18  ;;  %v2718_v18 = vld [vmem:[#allocation5 + $0x148] ss:$16 sps:$4 sm:$0xff]  }
  0x87   :  { %1408 = vmatprep.subr.bf16.mxu0 %v2645_v22  ;;  %v106_v22 = vld [vmem:[#allocation2 + $0x58] sm:$0xff] }
  0x8a   :  { %2396 = vmatmul.mubr.msk.bf16.vlgmr.msra.gmra.mxu1 %vm1314_vm0, %v3116_v23  ;;  %1409 = vmatpush1.bf16.msra.mxu0 %v2643_v25  ;;  %v2729_v25 = vld [vmem:[#allocation5 + $0x2ec] ss:$16 sps:$4 sm:$0xff]  }
  0x8b   :  { %1491 = vmatpush1.bf16.msra.mxu1 %v2640_v24  ;;  %1410 = vmatprep.subr.bf16.mxu0 %v2651_v27  ;;  %v2726_v24 = vld [vmem:[#allocation5 + $0x12c] ss:$16 sps:$4 sm:$0xff]   ;;  %v2724_v27 = vld [vmem:[#allocation5 + $0x128] ss:$16 sps:$4 sm:$0xff]  }
  0x8c   :  { %1492 = vmatprep.subr.bf16.mxu1 %v2648_v26  ;;  %1522 = vmatprep.mubr.bf16.mxu1 %v3103_v53  ;;  %v2684_v53 = vld [vmem:[#allocation5 + $0xc] ss:$16 sps:$4 sm:$0xff]   ;;  %v3124_v26 = vpack.c.bf16 %v106_v22, %v99_v20  ;;  %v2808_v20 = vld [vmem:[#allocation5 + $0x568] ss:$16 sps:$4 sm:$0xff]  }
  0x8d   :  { %v2811_v22 = vld [vmem:[#allocation5 + $0x328] ss:$16 sps:$4 sm:$0xff]  }
  0x8e   :  { %1411 = vmatpush1.bf16.msra.mxu0 %v2649_v29  ;;  %v2732_v29 = vld [vmem:[#allocation5 + $0x10c] ss:$16 sps:$4 sm:$0xff]  }
  0x8f   :  { %1493 = vmatpush1.bf16.msra.mxu1 %v2646_v28  ;;  %1412 = vmatprep.subr.bf16.mxu0 %v2657_v31  ;;  %v2727_v28 = vld [vmem:[#allocation5 + $0x2e8] ss:$16 sps:$4 sm:$0xff]  }
  0x90   :  { %1494 = vmatprep.subr.bf16.mxu1 %v2654_v30  ;;  %v2735_v30 = vld [vmem:[#allocation5 + $0x2cc] ss:$16 sps:$4 sm:$0xff]   ;;  %v2730_v31 = vld [vmem:[#allocation5 + $0x108] ss:$16 sps:$4 sm:$0xff]  }
  0x92   :  { %1413 = vmatpush1.bf16.msra.mxu0 %v2655_v33  ;;  %v2738_v33 = vld [vmem:[#allocation5 + $0x4ec] ss:$16 sps:$4 sm:$0xff]  }
  0x93   :  { %1495 = vmatpush1.bf16.msra.mxu1 %v2652_v32  ;;  %1414 = vmatprep.subr.bf16.mxu0 %v2663_v35  ;;  %v2733_v32 = vld [vmem:[#allocation5 + $0x2c8] ss:$16 sps:$4 sm:$0xff]  }
  0x94   :  { %1496 = vmatprep.subr.bf16.mxu1 %v2660_v34  ;;  %v2741_v34 = vld [vmem:[#allocation5 + $0x2ac] ss:$16 sps:$4 sm:$0xff]   ;;  %v2736_v35 = vld [vmem:[#allocation5 + $0x4e8] ss:$16 sps:$4 sm:$0xff]  }
  0x96   :  { %1415 = vmatpush1.bf16.msra.mxu0 %v2661_v37  ;;  %v2744_v37 = vld [vmem:[#allocation5 + $0x4cc] ss:$16 sps:$4 sm:$0xff]  }
  0x97   :  { %1497 = vmatpush1.bf16.msra.mxu1 %v2658_v36  ;;  %1416 = vmatprep.subr.bf16.mxu0 %v2669_v39  ;;  %v2739_v36 = vld [vmem:[#allocation5 + $0x2a8] ss:$16 sps:$4 sm:$0xff]  }
  0x98   :  { %1498 = vmatprep.subr.bf16.mxu1 %v2666_v38  ;;  %v2747_v38 = vld [vmem:[#allocation5 + $0x28c] ss:$16 sps:$4 sm:$0xff]   ;;  %v2742_v39 = vld [vmem:[#allocation5 + $0x4c8] ss:$16 sps:$4 sm:$0xff]  }
  0x9a   :  { %1417 = vmatpush1.bf16.msra.mxu0 %v2667_v43  ;;  %v2748_v43 = vld [vmem:[#allocation5 + $0x4a8] ss:$16 sps:$4 sm:$0xff]  }
  0x9b   :  { %1499 = vmatpush1.bf16.msra.mxu1 %v2664_v40  ;;  %1418 = vmatprep.subr.bf16.mxu0 %v2675_v46  ;;  %v2745_v40 = vld [vmem:[#allocation5 + $0x288] ss:$16 sps:$4 sm:$0xff]   ;;  %v2759_v46 = vld [vmem:[#allocation5 + $0x24c] ss:$16 sps:$4 sm:$0xff]  }
  0x9c   :  { %1500 = vmatprep.subr.bf16.mxu1 %v2672_v45  ;;  %v2751_v45 = vld [vmem:[#allocation5 + $0x268] ss:$16 sps:$4 sm:$0xff]  }
  0x9e   :  { %1419 = vmatpush1.bf16.msra.mxu0 %v2673_v48  ;;  %v2757_v48 = vld [vmem:[#allocation5 + $0x248] ss:$16 sps:$4 sm:$0xff]  }
  0x9f   :  { %1501 = vmatpush1.bf16.msra.mxu1 %v2670_v47  ;;  %1420 = vmatprep.subr.bf16.mxu0 %v2681_v50  ;;  %v2754_v47 = vld [vmem:[#allocation5 + $0x488] ss:$16 sps:$4 sm:$0xff]  }
  0xa0   :  { %1502 = vmatprep.subr.bf16.mxu1 %v2678_v49  ;;  %v2762_v49 = vld [vmem:[#allocation5 + $0x46c] ss:$16 sps:$4 sm:$0xff]   ;;  %v2760_v50 = vld [vmem:[#allocation5 + $0x468] ss:$16 sps:$4 sm:$0xff]  }
  0xa2   :  { %1421 = vmatpush2.bf16.msra.mxu0 %v2679_v52  ;;  %v2768_v52 = vld [vmem:[#allocation5 + $0x44c] ss:$16 sps:$4 sm:$0xff]  }
  0xa3   :  { %1503 = vmatpush1.bf16.msra.mxu1 %v2676_v51  ;;  %1422 = vmatprep.subr.bf16.mxu0 %v2687_v55  ;;  %v2763_v51 = vld [vmem:[#allocation5 + $0x228] ss:$16 sps:$4 sm:$0xff]  }
  0xa4   :  { %1504 = vmatprep.subr.bf16.mxu1 %v2684_v53  ;;  %v2771_v53 = vld [vmem:[#allocation5 + $0x20c] ss:$16 sps:$4 sm:$0xff]   ;;  %v2769_v55 = vld [vmem:[#allocation5 + $0x208] ss:$16 sps:$4 sm:$0xff]  }
  0xa6   :  { %1423 = vmatpush2.bf16.msra.mxu0 %v2685_v57  ;;  %v2777_v57 = vld [vmem:[#allocation5 + $0x3ec] ss:$16 sps:$4 sm:$0xff]  }
  0xa7   :  { %1505 = vmatpush1.bf16.msra.mxu1 %v2682_v56  ;;  %1424 = vmatprep.subr.bf16.mxu0 %v2693_v59  ;;  %v2774_v56 = vld [vmem:[#allocation5 + $0x42c] ss:$16 sps:$4 sm:$0xff]   ;;  %v2775_v59 = vld [vmem:[#allocation5 + $0x3e8] ss:$16 sps:$4 sm:$0xff]  }
  0xa8   :  { %1506 = vmatprep.subr.bf16.mxu1 %v2690_v58  ;;  %v2772_v58 = vld [vmem:[#allocation5 + $0x428] ss:$16 sps:$4 sm:$0xff]  }
  0xaa   :  { %1425 = vmatpush2.bf16.msra.mxu0 %v2691_v61  ;;  %v2783_v61 = vld [vmem:[#allocation5 + $0x3cc] ss:$16 sps:$4 sm:$0xff]  }
  0xab   :  { %1507 = vmatpush2.bf16.msra.mxu1 %v2688_v60  ;;  %1426 = vmatprep.subr.bf16.mxu0 %v2699_v63  ;;  %v2780_v60 = vld [vmem:[#allocation5 + $0x40c] ss:$16 sps:$4 sm:$0xff]   ;;  %v2781_v63 = vld [vmem:[#allocation5 + $0x3c8] ss:$16 sps:$4 sm:$0xff]  }
  0xac   :  { %1508 = vmatprep.subr.bf16.mxu1 %v2696_v62  ;;  %v2778_v62 = vld [vmem:[#allocation5 + $0x408] ss:$16 sps:$4 sm:$0xff]  }
  0xae   :  { %1427 = vmatpush2.bf16.msra.mxu0 %v2697_v1  ;;  %v2789_v1 = vld [vmem:[#allocation5 + $0x3ac] ss:$16 sps:$4 sm:$0xff]  }
  0xaf   :  { %1509 = vmatpush2.bf16.msra.mxu1 %v2694_v0  ;;  %1428 = vmatprep.subr.bf16.mxu0 %v2705_v3  ;;  %v2786_v0 = vld [vmem:[#allocation5 + $0x5ec] ss:$16 sps:$4 sm:$0xff]   ;;  %v2787_v3 = vld [vmem:[#allocation5 + $0x3a8] ss:$16 sps:$4 sm:$0xff]  }
  0xb0   :  { %1510 = vmatprep.subr.bf16.mxu1 %v2702_v2  ;;  %v2784_v2 = vld [vmem:[#allocation5 + $0x5e8] ss:$16 sps:$4 sm:$0xff]  }
  0xb2   :  { %1429 = vmatpush2.bf16.msra.mxu0 %v2703_v5  ;;  %v2795_v5 = vld [vmem:[#allocation5 + $0x38c] ss:$16 sps:$4 sm:$0xff]  }
  0xb3   :  { %1511 = vmatpush2.bf16.msra.mxu1 %v2700_v4  ;;  %1430 = vmatprep.subr.bf16.mxu0 %v2711_v7  ;;  %v2792_v4 = vld [vmem:[#allocation5 + $0x5cc] ss:$16 sps:$4 sm:$0xff]   ;;  %v2793_v7 = vld [vmem:[#allocation5 + $0x388] ss:$16 sps:$4 sm:$0xff]  }
  0xb4   :  { %1512 = vmatprep.subr.bf16.mxu1 %v2708_v6  ;;  %v2790_v6 = vld [vmem:[#allocation5 + $0x5c8] ss:$16 sps:$4 sm:$0xff]  }
  0xb6   :  { %1431 = vmatpush2.bf16.msra.mxu0 %v2709_v9  ;;  %v2801_v9 = vld [vmem:[#allocation5 + $0x36c] ss:$16 sps:$4 sm:$0xff]  }
  0xb7   :  { %1513 = vmatpush2.bf16.msra.mxu1 %v2706_v8  ;;  %1432 = vmatprep.subr.bf16.mxu0 %v2717_v11  ;;  %v2798_v8 = vld [vmem:[#allocation5 + $0x5ac] ss:$16 sps:$4 sm:$0xff]   ;;  %v2799_v11 = vld [vmem:[#allocation5 + $0x368] ss:$16 sps:$4 sm:$0xff]  }
  0xb8   :  { %1514 = vmatprep.subr.bf16.mxu1 %v2714_v10  ;;  %v2796_v10 = vld [vmem:[#allocation5 + $0x5a8] ss:$16 sps:$4 sm:$0xff]  }
  0xba   :  { %1433 = vmatpush2.bf16.msra.mxu0 %v2715_v15  ;;  %v2807_v15 = vld [vmem:[#allocation5 + $0x34c] ss:$16 sps:$4 sm:$0xff]  }
  0xbb   :  { %1515 = vmatpush2.bf16.msra.mxu1 %v2712_v14  ;;  %1434 = vmatprep.subr.bf16.mxu0 %v2723_v17  ;;  %v2804_v14 = vld [vmem:[#allocation5 + $0x58c] ss:$16 sps:$4 sm:$0xff]   ;;  %v2805_v17 = vld [vmem:[#allocation5 + $0x348] ss:$16 sps:$4 sm:$0xff]  }
  0xbc   :  { %1516 = vmatprep.subr.bf16.mxu1 %v2720_v16  ;;  %v2802_v16 = vld [vmem:[#allocation5 + $0x588] ss:$16 sps:$4 sm:$0xff]  }
  0xbe   :  { %1435 = vmatpush2.bf16.msra.mxu0 %v2721_v19  ;;  %v2813_v19 = vld [vmem:[#allocation5 + $0x32c] ss:$16 sps:$4 sm:$0xff]  }
  0xbf   :  { %1517 = vmatpush2.bf16.msra.mxu1 %v2718_v18  ;;  %1533 = vmatprep.subr.bf16.mxu0 %v2729_v25  ;;  %v2810_v18 = vld [vmem:[#allocation5 + $0x56c] ss:$16 sps:$4 sm:$0xff]  }
  0xc0   :  { %1518 = vmatprep.subr.bf16.mxu1 %v2726_v24  ;;  %v2816_v24 = vld [vmem:[#allocation5 + $0x54c] ss:$16 sps:$4 sm:$0xff]  }
  0xc1   :  { %1437 = vmatmul.mubr.bf16.vlgmr.msra.gmra.mxu0 %v3124_v26  ;;  %v2819_v25 = vld [vmem:[#allocation5 + $0x30c] ss:$16 sps:$4 sm:$0xff]  }
  0xc2   :  { %1534 = vmatpush1.bf16.msra.mxu0 %v2727_v28  ;;  %1565 = vmatprep.mubr.bf16.mxu0 %v3105_v54  ;;  %v2756_v54 = vld [vmem:[#allocation5 + $0x48c] ss:$16 sps:$4 sm:$0xff]   ;;  %v2817_v28 = vld [vmem:[#allocation5 + $0x308] ss:$16 sps:$4 sm:$0xff]  }
  0xc3   :  { %1519 = vmatpush2.bf16.msra.mxu1 %v2724_v27  ;;  %1535 = vmatprep.subr.bf16.mxu0 %v2735_v30  ;;  %v2814_v27 = vld [vmem:[#allocation5 + $0x548] ss:$16 sps:$4 sm:$0xff]  }
  0xc4   :  { %1520 = vmatprep.subr.bf16.mxu1 %v2732_v29  ;;  %v2822_v29 = vld [vmem:[#allocation5 + $0x52c] ss:$16 sps:$4 sm:$0xff]   ;;  %v2820_v30 = vld [vmem:[#allocation5 + $0x528] ss:$16 sps:$4 sm:$0xff]  }
  0xc6   :  { %1536 = vmatpush1.bf16.msra.mxu0 %v2733_v32  ;;  %v2823_v32 = vld [vmem:[#allocation5 + $0x508] ss:$16 sps:$4 sm:$0xff]  }
  0xc7   :  { %1521 = vmatpush2.bf16.msra.mxu1 %v2730_v31  ;;  %1537 = vmatprep.subr.bf16.mxu0 %v2741_v34  ;;  %v2825_v31 = vld [vmem:[#allocation5 + $0x50c] ss:$16 sps:$4 sm:$0xff]   ;;  %v2826_v34 = vld [vmem:[#allocation5 + $0x608] ss:$16 sps:$4 sm:$0xff]  }
  0xc8   :  { %1576 = vmatprep.subr.bf16.mxu1 %v2738_v33  ;;  %v2828_v33 = vld [vmem:[#allocation5 + $0x60c] ss:$16 sps:$4 sm:$0xff]  }
  0xca   :  { %1523 = vmatmul.mubr.bf16.vlgmr.msra.gmra.mxu1 %v3109_v12  ;;  %1538 = vmatpush1.bf16.msra.mxu0 %v2739_v36  ;;  %v2765_v12 = vld [vmem:[#allocation5 + $0x22c] ss:$16 sps:$4 sm:$0xff]  }
  0xcb   :  { %1577 = vmatpush1.bf16.msra.mxu1 %v2736_v35  ;;  %1539 = vmatprep.subr.bf16.mxu0 %v2747_v38  ;;  %v2829_v35 = vld [vmem:[#allocation8 + $0x78] sm:$0xff]   ;;  %v2833_v38 = vld [vmem:[#allocation8 + $0x68] sm:$0xff]  }
  0xcc   :  { %1578 = vmatprep.subr.bf16.mxu1 %v2744_v37  ;;  %1608 = vmatprep.mubr.bf16.mxu1 %v3121_v44  ;;  %v2766_v44 = vld [vmem:[#allocation5 + $0x448] ss:$16 sps:$4 sm:$0xff]   ;;  %v2830_v36 = vld [vmem:[#allocation8 + $0x38] sm:$0xff]  }
  0xcd   :  { %v2832_v37 = vld [vmem:[#allocation8 + $0x30] sm:$0xff]  }
  0xce   :  { %1540 = vmatpush1.bf16.msra.mxu0 %v2745_v40  ;;  %v2835_v40 = vld [vmem:[#allocation8 + $0x60] sm:$0xff]  }
  0xcf   :  { %1579 = vmatpush1.bf16.msra.mxu1 %v2742_v39  ;;  %1541 = vmatprep.subr.bf16.mxu0 %v2753_v42  ;;  %v2834_v39 = vld [vmem:[#allocation8 + $0x28] sm:$0xff]   ;;  %v2840_v42 = vld [vmem:[#allocation8 + $0x10] sm:$0xff]  }
  0xd0   :  { %1580 = vmatprep.subr.bf16.mxu1 %v2750_v41  ;;  %v2837_v41 = vld [vmem:[#allocation8 + $0x58] sm:$0xff]  }
  0xd2   :  { %1542 = vmatpush1.bf16.msra.mxu0 %v2751_v45  ;;  %v2842_v45 = vld [vmem:[#allocation8 + $0x8] sm:$0xff]  }
  0xd3   :  { %1581 = vmatpush1.bf16.msra.mxu1 %v2748_v43  ;;  %1543 = vmatprep.subr.bf16.mxu0 %v2759_v46  ;;  %v2841_v43 = vld [vmem:[#allocation8 + $0x48] sm:$0xff]   ;;  %v2844_v46 = vld [vmem:[#allocation8] sm:$0xff]  }
  0xd4   :  { %1582 = vmatprep.subr.bf16.mxu1 %v2756_v54  ;;  %v2843_v54 = vld [vmem:[#allocation8 + $0x40] sm:$0xff]  }
  0xd6   :  { %1544 = vmatpush1.bf16.msra.mxu0 %v2757_v48  ;;  %v2846_v48 = vld [vmem:[#allocation8 + $0xb8] sm:$0xff]  }
  0xd7   :  { %1583 = vmatpush1.bf16.msra.mxu1 %v2754_v47  ;;  %1545 = vmatprep.subr.bf16.mxu0 %v2765_v12  ;;  %v2845_v47 = vld [vmem:[#allocation8 + $0xf8] sm:$0xff]   ;;  %v2848_v12 = vld [vmem:[#allocation8 + $0xb0] sm:$0xff]  }
  0xd8   :  { %1584 = vmatprep.subr.bf16.mxu1 %v2762_v49  ;;  %v2847_v49 = vld [vmem:[#allocation8 + $0xf0] sm:$0xff]  }
  0xda   :  { %1546 = vmatpush1.bf16.msra.mxu0 %v2763_v51  ;;  %v2850_v51 = vld [vmem:[#allocation8 + $0xa8] sm:$0xff]  }
  0xdb   :  { %1585 = vmatpush1.bf16.msra.mxu1 %v2760_v50  ;;  %1547 = vmatprep.subr.bf16.mxu0 %v2771_v53  ;;  %v2849_v50 = vld [vmem:[#allocation8 + $0xe8] sm:$0xff]   ;;  %v2852_v53 = vld [vmem:[#allocation8 + $0xa0] sm:$0xff]  }
  0xdc   :  { %1586 = vmatprep.subr.bf16.mxu1 %v2768_v52  ;;  %v2851_v52 = vld [vmem:[#allocation8 + $0xe0] sm:$0xff]  }
  0xde   :  { %1548 = vmatpush1.bf16.msra.mxu0 %v2769_v55  ;;  %v2853_v55 = vld [vmem:[#allocation8 + $0xd8] sm:$0xff]  }
  0xdf   :  { %1587 = vmatpush1.bf16.msra.mxu1 %v2766_v44  ;;  %1549 = vmatprep.subr.bf16.mxu0 %v2777_v57  ;;  %v2854_v57 = vld [vmem:[#allocation8 + $0x98] sm:$0xff]  }
  0xe0   :  { %1588 = vmatprep.subr.bf16.mxu1 %v2774_v56  ;;  %v314_v56 = vlaneseq }
  0xe2   :  { %1550 = vmatpush2.bf16.msra.mxu0 %v2775_v59 }
  0xe3   :  { %1589 = vmatpush1.bf16.msra.mxu1 %v2772_v58  ;;  %1551 = vmatprep.subr.bf16.mxu0 %v2783_v61  ;;  %v2855_v58 = vld [vmem:[#allocation8 + $0xd0] sm:$0xff]  }
  0xe4   :  { %1590 = vmatprep.subr.bf16.mxu1 %v2780_v60  ;;  %v3135_v60 = vshrl.u32 %v314_v56, 7  ;;  %v2856_v61 = vld [vmem:[#allocation8 + $0x90] sm:$0xff]  }
  0xe6   :  { %1552 = vmatpush2.bf16.msra.mxu0 %v2781_v63  ;;  %v2857_v63 = vld [vmem:[#allocation8 + $0xc8] sm:$0xff]  }
  0xe7   :  { %1591 = vmatpush1.bf16.msra.mxu1 %v2778_v62  ;;  %1553 = vmatprep.subr.bf16.mxu0 %v2789_v1  ;;  %v316_v1 = vsub.s32 0, %v3135_v60 }
  0xe8   :  { %1592 = vmatprep.subr.bf16.mxu1 %v2786_v0 }
  0xea   :  { %1554 = vmatpush2.bf16.msra.mxu0 %v2787_v3  ;;  %v3138_v3 = vld [vmem:[#allocation7] sm:$0xf] }
  0xeb   :  { %1593 = vmatpush2.bf16.msra.mxu1 %v2784_v2  ;;  %1555 = vmatprep.subr.bf16.mxu0 %v2795_v5  ;;  %v2858_v2 = vld [vmem:[#allocation8 + $0x88] sm:$0xff]   ;;  %v2859_v5 = vld [vmem:[#allocation8 + $0xc0] sm:$0xff]  }
  0xec   :  { %1594 = vmatprep.subr.bf16.mxu1 %v2792_v4 }
  0xee   :  { %1556 = vmatpush2.bf16.msra.mxu0 %v2793_v7 }
  0xef   :  { %1595 = vmatpush2.bf16.msra.mxu1 %v2790_v6  ;;  %1557 = vmatprep.subr.bf16.mxu0 %v2801_v9  ;;  %v320_v6 = vsub.s32 1, %v3135_v60  ;;  %v2860_v9 = vld [vmem:[#allocation8 + $0x80] sm:$0xff]  }
  0xf0   :  { %1596 = vmatprep.subr.bf16.mxu1 %v2798_v8  ;;  %v317_v8 = vrot.slane %v3138_v3, %v316_v1 }
  0xf2   :  { %1558 = vmatpush2.bf16.msra.mxu0 %v2799_v11  ;;  %v321_v11 = vrot.slane %v3138_v3, %v320_v6 }
  0xf3   :  { %1597 = vmatpush2.bf16.msra.mxu1 %v2796_v10  ;;  %1559 = vmatprep.subr.bf16.mxu0 %v2807_v15 }
  0xf4   :  { %1598 = vmatprep.subr.bf16.mxu1 %v2804_v14 }
  0xf6   :  { %1560 = vmatpush2.bf16.msra.mxu0 %v2805_v17 }
  0xf7   :  { %1599 = vmatpush2.bf16.msra.mxu1 %v2802_v16  ;;  %1561 = vmatprep.subr.bf16.mxu0 %v2813_v19 }
  0xf8   :  { %1600 = vmatprep.subr.bf16.mxu1 %v2810_v18 }
  0xfa   :  { %1562 = vmatpush2.bf16.msra.mxu0 %v2811_v22 }
  0xfb   :  { %1601 = vmatpush2.bf16.msra.mxu1 %v2808_v20  ;;  %1563 = vmatprep.subr.bf16.mxu0 %v2819_v25 }
  0xfc   :  { %1602 = vmatprep.subr.bf16.mxu1 %v2816_v24 }
  0xfe   :  { %1564 = vmatpush2.bf16.msra.mxu0 %v2817_v28 }
  0xff   :  { %1603 = vmatpush2.bf16.msra.mxu1 %v2814_v27  ;;  %2445 = vmatprep.subr.bf16.mxu0 %v2829_v35 }
 0x100   :  { %1604 = vmatprep.subr.bf16.mxu1 %v2822_v29 }
 0x101   :  { %1566 = vmatmul.mubr.bf16.vlgmr.msra.gmra.mxu0 %v3111_v13  ;;  %v2831_v13 = vld [vmem:[#allocation8 + $0x70] sm:$0xff]  }
 0x102   :  { %2446 = vmatpush3.bf16.msra.mxu0 %v2830_v36 }
 0x103   :  { %1605 = vmatpush2.bf16.msra.mxu1 %v2820_v30  ;;  %2447 = vmatprep.subr.bf16.mxu0 %v2831_v13 }
 0x104   :  { %1606 = vmatprep.subr.bf16.mxu1 %v2825_v31 }
 0x106   :  { %2448 = vmatpush3.bf16.msra.mxu0 %v2832_v37 }
 0x107   :  { %1607 = vmatpush2.bf16.msra.mxu1 %v2823_v32  ;;  %2449 = vmatprep.subr.bf16.mxu0 %v2833_v38 }
 0x108   :  { %1633 = vmatprep.subr.bf16.mxu1 %v2828_v33 }
 0x10a   :  { %1609 = vmatmul.mubr.bf16.vlgmr.msra.gmra.mxu1 %v3124_v26  ;;  %2450 = vmatpush3.bf16.msra.mxu0 %v2834_v39  ;;  %v2836_v26 = vld [vmem:[#allocation8 + $0x20] sm:$0xff]  }
 0x10b   :  { %1634 = vmatpush1.bf16.msra.mxu1 %v2826_v34  ;;  %1651 = vmatprep.mubr.bf16.mxu1 %v3036_v21  ;;  %v2838_v21 = vld [vmem:[#allocation8 + $0x18] sm:$0xff]  }
 0x10c   :  { %2451 = vmatprep.subr.bf16.mxu0 %v2835_v40  ;;  %2467 = vmatprep.subr.bf16.mxu1 %v2845_v47 }
 0x10e   :  { %2452 = vmatpush3.bf16.msra.mxu0 %v2836_v26 }
 0x10f   :  { %2453 = vmatprep.subr.bf16.mxu0 %v2837_v41 }
 0x112   :  { %2397 = vmatmul.mubr.msk.bf16.vlgmr.msra.gmra.mxu1 %vm1314_vm0, %v3116_v23  ;;  %v2839_v23 = vld [vmem:[#allocation8 + $0x50] sm:$0xff]   ;;  %2454 = vmatpush3.bf16.msra.mxu0 %v2838_v21 }
 0x113   :  { %2455 = vmatprep.subr.bf16.mxu0 %v2839_v23  ;;  %2468 = vmatpush3.bf16.msra.mxu1 %v2846_v48 }
 0x114   :  { %2469 = vmatprep.subr.bf16.mxu1 %v2847_v49 }
 0x116   :  { %2456 = vmatpush3.bf16.msra.mxu0 %v2840_v42 }
 0x117   :  { %2457 = vmatprep.subr.bf16.mxu0 %v2841_v43  ;;  %2470 = vmatpush3.bf16.msra.mxu1 %v2848_v12 }
 0x118   :  { %2471 = vmatprep.subr.bf16.mxu1 %v2849_v50 }
 0x11a   :  { %2458 = vmatpush3.bf16.msra.mxu0 %v2842_v45 }
 0x11b   :  { %2459 = vmatprep.subr.bf16.mxu0 %v2843_v54  ;;  %2472 = vmatpush3.bf16.msra.mxu1 %v2850_v51 }
 0x11c   :  { %2473 = vmatprep.subr.bf16.mxu1 %v2851_v52 }
 0x11e   :  { %2460 = vmatpush3.bf16.msra.mxu0 %v2844_v46 }
 0x11f   :  { %2474 = vmatpush3.bf16.msra.mxu1 %v2852_v53 }
 0x120   :  { %2475 = vmatprep.subr.bf16.mxu1 %v2853_v55 }
 0x123   :  { %2476 = vmatpush3.bf16.msra.mxu1 %v2854_v57  ;;  %v328_v57 = vsub.s32 3, %v3135_v60 }
 0x124   :  { %2477 = vmatprep.subr.bf16.mxu1 %v2855_v58 }
 0x127   :  { %2478 = vmatpush3.bf16.msra.mxu1 %v2856_v61 }
 0x128   :  { %2479 = vmatprep.subr.bf16.mxu1 %v2857_v63  ;;  %v329_v63 = vrot.slane %v3138_v3, %v328_v57 }
 0x12b   :  { %2480 = vmatpush3.bf16.msra.mxu1 %v2858_v2 }
 0x12c   :  { %2481 = vmatprep.subr.bf16.mxu1 %v2859_v5 }
 0x12f   :  { %2482 = vmatpush3.bf16.msra.mxu1 %v2860_v9 }
 0x141   :  { %v1352_v62 = vpop.f32.mrf.mxu0 }
 0x142   :  { %v1395_v44 = vpop.f32.mrf.mxu1  ;;  %v1353_v15 = vadd.f32 %v1352_v62, %v317_v8 }
 0x143   :  { %v1354_v4 = vpop.f32.mrf.mxu0 }
 0x144   :  { %v1397_v59 = vpop.f32.mrf.mxu1  ;;  %v1355_v17 = vadd.f32 %v1354_v4, %v321_v11  ;;  %v1396_v22 = vadd.f32 %v1395_v44, %v1353_v15  ;;  %v324_v44 = vsub.s32 2, %v3135_v60 }
 0x145   :  { %v1356_v10 = vpop.f32.mrf.mxu0 }
 0x146   :  { %v1399_v0 = vpop.f32.mrf.mxu1  ;;  %v1357_v18 = vadd.f32 %v1356_v10, %v317_v8  ;;  %v1398_v27 = vadd.f32 %v1397_v59, %v1355_v17  ;;  %v325_v59 = vrot.slane %v3138_v3, %v324_v44 }
 0x147   :  { %v1358_v16 = vpop.f32.mrf.mxu0 }
 0x148   :  { %v1401_v7 = vpop.f32.mrf.mxu1  ;;  %v1359_v24 = vadd.f32 %v1358_v16, %v321_v11  ;;  %v1400_v28 = vadd.f32 %v1399_v0, %v1357_v18 }
 0x14a   :  { %v1481_v14 = vpop.f32.mrf.mxu1  ;;  %v1402_v32 = vadd.f32 %v1401_v7, %v1359_v24 }
 0x14c   :  { %v1483_v19 = vpop.f32.mrf.mxu1 }
 0x14e   :  { %v1485_v30 = vpop.f32.mrf.mxu1 }
 0x150   :  { %v1487_v38 = vpop.f32.mrf.mxu1 }
 0x181   :  { %v1438_v20 = vpop.f32.mrf.mxu0 }
 0x182   :  { %v1439_v29 = vadd.f32 %v1438_v20, %v1396_v22 }
 0x183   :  { %v1440_v25 = vpop.f32.mrf.mxu0 }
 0x184   :  { %v1441_v33 = vadd.f32 %v1440_v25, %v1398_v27  ;;  %v1482_v36 = vadd.f32 %v1481_v14, %v1439_v29 }
 0x185   :  { %v1442_v31 = vpop.f32.mrf.mxu0 }
 0x186   :  { %v1443_v34 = vadd.f32 %v1442_v31, %v1400_v28  ;;  %v1484_v39 = vadd.f32 %v1483_v19, %v1441_v33 }
 0x187   :  { %v1444_v35 = vpop.f32.mrf.mxu0 }
 0x188   :  { %v1486_v13 = vadd.f32 %v1485_v30, %v1443_v34  ;;  %v1445_v37 = vadd.f32 %v1444_v35, %v1402_v32 }
 0x18a   :  { %v1662_v40 = vpack.c.bf16 %v1486_v13, %v1482_v36  ;;  %v1488_v26 = vadd.f32 %v1487_v38, %v1445_v37  ;;  %v1524_v12 = vpop.f32.mrf.mxu1  ;;  %v2861_v37 = vld [vmem:[#allocation10 + $0x38] sm:$0xff]   ;;  %v3037_v38 = vmov 0.0  }
 0x18b   :  { %v1525_v1 = vadd.f32 %v1524_v12, %v325_v59  ;;  %2498 = vmatprep.subr.bf16.mxu0 %v3037_v38 }
 0x18c   :  { %v2398_v41 = vmul.bf16 3216621497, %v1662_v40  ;;  %v1663_v21 = vpack.c.bf16 %v1488_v26, %v1484_v39  ;;  %v1526_v50 = vpop.f32.mrf.mxu1  ;;  %v2862_v39 = vld [vmem:[#allocation10 + $0x30] sm:$0xff]   ;;  %v2863_v40 = vld [vmem:[#allocation10 + $0x28] sm:$0xff]   ;;  %v2864_v26 = vld [vmem:[#allocation10 + $0x20] sm:$0xff]  }
 0x18d   :  { %v1527_v6 = vadd.f32 %v1526_v50, %v329_v63  ;;  %v2402_v50 = vld [vmem:[%s3160_s4] ss:$0 sm:$0xff]  ;;  %s3039_s4 = smov [#allocation11]  }
 0x18e   :  { %2869 = vpow.bf16 %v2398_v41  ;;  %v2399_v23 = vmul.bf16 3216621497, %v1663_v21  ;;  %v1528_v51 = vpop.f32.mrf.mxu1  ;;  %v2865_v41 = vld [vmem:[#allocation10 + $0x18] sm:$0xff]   ;;  %v2866_v21 = vld [vmem:[#allocation10 + $0x10] sm:$0xff]  }
 0x18f   :  { %v1529_v2 = vadd.f32 %v1528_v51, %v325_v59 }
 0x190   :  { %2871 = vpow.bf16 %v2399_v23  ;;  %v1530_v53 = vpop.f32.mrf.mxu1  ;;  %v2867_v23 = vld [vmem:[#allocation10 + $0x8] sm:$0xff]  }
 0x191   :  { %v1531_v7 = vadd.f32 %v1530_v53, %v329_v63 }
 0x19c   :  { %v2870_v42 = vpop.eup %2869 }
 0x19d   :  { %v1682_v43 = vadd.bf16 1065369472, %v2870_v42  ;;  %v2868_v42 = vld [vmem:[#allocation10] sm:$0xff]  }
 0x19e   :  { %v2872_v45 = vpop.eup %2871 }
 0x19f   :  { %v1683_v54 = vadd.bf16 1065369472, %v2872_v45  ;;  %2873 = vrcp.bf16 %v1682_v43 }
 0x1a1   :  { %2875 = vrcp.bf16 %v1683_v54 }
 0x1ad   :  { %v2874_v46 = vpop.eup %2873 }
 0x1ae   :  { %v1687_v49 = vmul.bf16 1065369472, %v2874_v46 }
 0x1af   :  { %v2876_v47 = vpop.eup %2875 }
 0x1b0   :  { %v1689_v48 = vmul.bf16 1065369472, %v2876_v47 }
 0x1b2   :  { %1989 = vmatprep.mubr.bf16.mxu0 %v1689_v48 }
 0x1b3   :  { %1990 = vmatmul.mubr.bf16.vlgmr.msra.gmra.mxu0 %v1687_v49 }
 0x1b4   :  { %2499 = vmatpush3.bf16.msra.mxu0 %v2861_v37  ;;  %2514 = vmatprep.mubr.msk.bf16.mxu0 %vm3038_vm1, %v3037_v38 }
 0x1b5   :  { %2500 = vmatprep.subr.bf16.mxu0 %v3037_v38 }
 0x1b8   :  { %2501 = vmatpush3.bf16.msra.mxu0 %v2862_v39 }
 0x1b9   :  { %2502 = vmatprep.subr.bf16.mxu0 %v3037_v38 }
 0x1bc   :  { %2503 = vmatpush3.bf16.msra.mxu0 %v2863_v40 }
 0x1bd   :  { %2504 = vmatprep.subr.bf16.mxu0 %v3037_v38 }
 0x1c0   :  { %2505 = vmatpush3.bf16.msra.mxu0 %v2864_v26 }
 0x1c1   :  { %v1567_v52 = vpop.f32.mrf.mxu0  ;;  %2506 = vmatprep.subr.bf16.mxu0 %v3037_v38 }
 0x1c2   :  { %v1568_v8 = vadd.f32 %v1567_v52, %v1525_v1 }
 0x1c3   :  { %v1569_v55 = vpop.f32.mrf.mxu0 }
 0x1c4   :  { %v1570_v11 = vadd.f32 %v1569_v55, %v1527_v6  ;;  %2507 = vmatpush3.bf16.msra.mxu0 %v2865_v41 }
 0x1c5   :  { %v1571_v61 = vpop.f32.mrf.mxu0  ;;  %2508 = vmatprep.subr.bf16.mxu0 %v3037_v38 }
 0x1c6   :  { %v1572_v9 = vadd.f32 %v1571_v61, %v1529_v2  ;;  %v2436_v2 = vld [vmem:[%s3162_s6] ss:$0 sm:$0xff]  ;;  %s2186_s6 = sshll.u32 %s3039_s4, 4  ;;  %s2187_s6 = int_to_ptr.vmem [resolvable:$true] %s2186_s6 }
 0x1c7   :  { %v1573_v4 = vpop.f32.mrf.mxu0  ;;  %s2997_s8 = scalar_lea.vmem %s2187_s6, 256  ;;  %p3002_p12 = scmp.lt.s32.totalorder %s2187_s6, %s2187_s6 }
 0x1c8   :  { %v1574_v14 = vadd.f32 %v1573_v4, %v1531_v7  ;;  %2509 = vmatpush3.bf16.msra.mxu0 %v2866_v21  ;;  %p2998_p11 = scmp.ne.s32.totalorder %s2187_s6, %s2997_s8  ;;  %p3003_p13 = scmp.lt.s32.totalorder %s2997_s8, %s2997_s8 }
 0x1c9   :  { %2510 = vmatprep.subr.bf16.mxu0 %v3037_v38 }
 0x1ca   :  { %v1610_v56 = vpop.f32.mrf.mxu1  ;;  %p3004_p0 = por %p3003_p13, %p3002_p12 }
 0x1cb   :  { %v1611_v60 = vadd.f32 %v1610_v56, %v1568_v8 }
 0x1cc   :  { %v1612_v58 = vpop.f32.mrf.mxu1  ;;  %2511 = vmatpush3.bf16.msra.mxu0 %v2867_v23  ;;  %p3005_p1 = pnand %p3004_p0, %p2998_p11 }
 0x1cd   :  { %v1613_v17 = vadd.f32 %v1612_v58, %v1570_v11  ;;  %2512 = vmatprep.subr.bf16.mxu0 %v3037_v38 }
 0x1ce   :  { %v1614_v62 = vpop.f32.mrf.mxu1 }
 0x1cf   :  { %v1615_v15 = vadd.f32 %v1614_v62, %v1572_v9 }
 0x1d0   :  { %v1616_v0 = vpop.f32.mrf.mxu1  ;;  %2513 = vmatpush3.bf16.msra.mxu0 %v2868_v42 }
 0x1d1   :  { %v1617_v18 = vadd.f32 %v1616_v0, %v1574_v14 }
 0x1d2   :  { %v1653_v5 = vpop.f32.mrf.mxu1 }
 0x1d3   :  { %v1654_v19 = vadd.f32 %v1653_v5, %v1611_v60 }
 0x1d4   :  { %v1655_v10 = vpop.f32.mrf.mxu1 }
 0x1d5   :  { %v1656_v22 = vadd.f32 %v1655_v10, %v1613_v17 }
 0x1d6   :  { %v1657_v16 = vpop.f32.mrf.mxu1 }
 0x1d7   :  { %v1658_v20 = vadd.f32 %v1657_v16, %v1615_v15 }
 0x1d8   :  { %v1659_v3 = vpop.f32.mrf.mxu1 }
 0x1d9   :  { %v1664_v24 = vpack.c.bf16 %v1658_v20, %v1654_v19  ;;  %v1660_v25 = vadd.f32 %v1659_v3, %v1617_v18 }
 0x1db   :  { %v2400_v27 = vmul.bf16 3216621497, %v1664_v24  ;;  %v1665_v28 = vpack.c.bf16 %v1660_v25, %v1656_v22 }
 0x1dd   :  { %2877 = vpow.bf16 %v2400_v27  ;;  %v2401_v29 = vmul.bf16 3216621497, %v1665_v28 }
 0x1df   :  { %2879 = vpow.bf16 %v2401_v29 }
 0x1eb   :  { %v2878_v30 = vpop.eup %2877 }
 0x1ec   :  { %v1684_v31 = vadd.bf16 1065369472, %v2878_v30 }
 0x1ed   :  { %v2880_v32 = vpop.eup %2879 }
 0x1ee   :  { %v1685_v33 = vadd.bf16 1065369472, %v2880_v32  ;;  %2881 = vrcp.bf16 %v1684_v31 }
 0x1f0   :  { %2883 = vrcp.bf16 %v1685_v33 }
 0x1fc   :  { %v2882_v34 = vpop.eup %2881 }
 0x1fd   :  { %v1691_v13 = vmul.bf16 1065369472, %v2882_v34 }
 0x1fe   :  { %v2884_v35 = vpop.eup %2883 }
 0x1ff   :  { %v1693_v36 = vmul.bf16 1065369472, %v2884_v35 }
 0x201   :  { %2030 = vmatprep.mubr.bf16.mxu1 %v1693_v36 }
 0x202   :  { %2031 = vmatmul.mubr.bf16.vlgmr.msra.gmra.mxu1 %v1691_v13 }
 0x273   :  { %v2461_v43 = vpop.f32.mrf.mxu0 }
 0x275   :  { %v2462_v45 = vpop.f32.mrf.mxu0 }
 0x276   :  { %v2463_v49 = vadd.f32 %v2462_v45, %v2461_v43 }
 0x277   :  { %v2464_v54 = vpop.f32.mrf.mxu0 }
 0x278   :  { %v1992_v44 = vadd.f32 %v2463_v49, %v2402_v50 }
 0x279   :  { %v2465_v46 = vpop.f32.mrf.mxu0 }
 0x27a   :  { %v2466_v12 = vadd.f32 %v2465_v46, %v2464_v54 }
 0x27c   :  { %v1995_v55 = vadd.f32 %v2466_v12, %v2402_v50 }
 0x2c2   :  { %v2483_v47 = vpop.f32.mrf.mxu1 }
 0x2c4   :  { %v2484_v48 = vpop.f32.mrf.mxu1 }
 0x2c5   :  { %v2485_v52 = vadd.f32 %v2484_v48, %v2483_v47 }
 0x2c6   :  { %v2486_v51 = vpop.f32.mrf.mxu1 }
 0x2c7   :  { %v2033_v57 = vadd.f32 %v2485_v52, %v1992_v44 }
 0x2c8   :  { %v2487_v53 = vpop.f32.mrf.mxu1 }
 0x2c9   :  { %v2488_v56 = vadd.f32 %v2487_v53, %v2486_v51 }
 0x2cb   :  { %v2036_v58 = vadd.f32 %v2488_v56, %v1995_v55 }
 0x2cd   :  { %v2039_v59 = vpack.c.bf16 %v2036_v58, %v2033_v57 }
 0x2cf   :  { %v2435_v61 = vmul.bf16 3216621497, %v2039_v59 }
 0x2d1   :  { %2885 = vpow.bf16 %v2435_v61 }
 0x2df   :  { %v2886_v62 = vpop.eup %2885 }
 0x2e0   :  { %v2044_v63 = vadd.bf16 1065369472, %v2886_v62 }
 0x2e2   :  { %2887 = vrcp.bf16 %v2044_v63 }
 0x2f0   :  { %v2888_v0 = vpop.eup %2887 }
 0x2f1   :  { %v2046_v1 = vmul.bf16 1065369472, %v2888_v0 }
 0x2f3   :  { %2515 = vmatmul.mubr.bf16.vlgmr.msra.gmra.mxu0 %v2046_v1 }
 0x3b3   :  { %v2152_v4 = vpop.f32.mrf.mxu0 }
 0x3b4   :  { %v2153_v5 = vadd.f32 %v2436_v2, %v2152_v4 }
 0x3b5   :  { %v2516_v6 = vpop.f32.mrf.mxu0 }
 0x3b6   :  { %2159 = vmax.xlane.f32.xlu0 %v2153_v5 }
 0x3b7   :  { %v2155_v7 = vpop.f32.mrf.mxu0 }
 0x3b8   :  { %v2156_v8 = vadd.f32 %v2436_v2, %v2155_v7 }
 0x3b9   :  { %v2517_v9 = vpop.f32.mrf.mxu0 }
 0x3ba   :  { %2161 = vmax.xlane.f32.xlu0 %v2156_v8 }
 0x43f   :  { %v2160_v10 = vpop.xlane.xlu0 %2159 }
 0x440   :  { %v2163_v11 = vsub.f32 %v2153_v5, %v2160_v10 }
 0x442   :  { %v2165_v14 = vmul.f32 1.442695, %v2163_v11 }
 0x443   :  { %v2162_v60 = vpop.xlane.xlu0 %2161 }
 0x444   :  { %v2164_v15 = vsub.f32 %v2156_v8, %v2162_v60  ;;  %2889 = vpow2.f32 %v2165_v14 }
 0x446   :  { %v2167_v16 = vmul.f32 1.442695, %v2164_v15 }
 0x448   :  { %2891 = vpow2.f32 %v2167_v16 }
 0x451   :  { %v2890_v17 = vpop.eup %2889 }
 0x452   :  { %2169 = vadd.xlane.f32.xlu1 %v2890_v17 }
 0x455   :  { %v2892_v18 = vpop.eup %2891 }
 0x456   :  { %2171 = vadd.xlane.f32.xlu1 %v2892_v18 }
 0x4db   :  { %v2170_v19 = vpop.xlane.xlu1 %2169 }
 0x4dc   :  { %2893 = vlog2.f32 %v2170_v19 }
 0x4df   :  { %v2172_v20 = vpop.xlane.xlu1 %2171 }
 0x4e0   :  { %2895 = vlog2.f32 %v2172_v20 }
 0x4e9   :  { %v2894_v3 = vpop.eup %2893 }
 0x4ea   :  { %v2174_v22 = vmul.f32 0.6931472, %v2894_v3 }
 0x4ec   :  { %v2177_v24 = vsub.f32 %v2163_v11, %v2174_v22 }
 0x4ed   :  { %v2896_v25 = vpop.eup %2895 }
 0x4ee   :  { %2179 = vst [vmem:[#allocation11] sm:$0xff] %v2177_v24  ;;  %v2176_v27 = vmul.f32 0.6931472, %v2896_v25 }
 0x4f0   :  { %v2178_v28 = vsub.f32 %v2164_v15, %v2176_v27 }
 0x4f2   :  { %2180 = vst [vmem:[#allocation11 + $0x8] sm:$0xff] %v2178_v28 }
 0x4f3   :  { %3008 = shalt.err (!%p3005_p1)
}
 0x4f4   :  { %s3040_s9 = smov 128   ;;  %s3041_s10 = smov 8  }
 0x4f5   :  { %2192 = dma.vmem_to_hbm [thread:$0]  %s2187_s6, 256, %s3163_s7, [#allocation4], %s3040_s9, %s3040_s9, %s3041_s10  }
 0x4f6   :  { %3023 = dma.done.wait [#allocation4], 256  }
 0x4f7   :  { %3024 = vsyncadd [#allocation4], 4294967040 }
 0x4f8   :  { %2196 = vsyncpa [#allocation3], 1 }
 0x4f9   :  { %2197 = vsyncpa [#allocation6], 1 }
 0x4fa   :  { %2198 = vsyncpa [#allocation9], 1 }
 0x4fb   :  { %2199 = vsyncpa [#allocation4], 1 }

// kernel: tpu_custom_call.1
= control target key start
LH: loop header
LB: loop body
LE: loop exit
PB: predicated region body
PF: predicated region fallthrough
CT: control target
= control target key end

     0   :  { %12 = vsyncpa [#allocation3], 0  ;;  %s3156_s0 = inlined_call_operand.hbm [shape: f32[16,784], index: 0, kind: input, shape index: {}]   ;;  %s3157_s1 = inlined_call_operand.hbm [shape: bf16[784,512], index: 1, kind: input, shape index: {}]   ;;  %s3158_s2 = inlined_call_operand.hbm [shape: f32[1,512], index: 2, kind: input, shape index: {}]   ;;  %s3159_s3 = inlined_call_operand.hbm [shape: bf16[512,128], index: 3, kind: input, shape index: {}]   ;;  %s3160_s4 = inlined_call_operand.vmem [shape: f32[1,128], index: 4, kind: input, shape index: {}]   ;;  %s3161_s5 = inlined_call_operand.hbm [shape: bf16[128,128], index: 5, kind: input, shape index: {}]   ;;  %s3162_s6 = inlined_call_operand.vmem [shape: f32[1,128], index: 6, kind: input, shape index: {}]   ;;  %s3163_s7 = inlined_call_operand.hbm [shape: f32[16,128], index: 7, kind: output, shape index: {}]  }
   0x1   :  { %13 = vsyncpa [#allocation6], 0 }
   0x2   :  { %14 = vsyncpa [#allocation9], 0 }
   0x3   :  { %15 = vsyncpa [#allocation4], 0  ;;  %s3025_s24 = smov [#allocation5]  }
   0x4   :  { %s33_s25 = sshll.u32 %s3025_s24, 4  ;;  %s34_s25 = int_to_ptr.vmem [resolvable:$true] %s33_s25 }
   0x5   :  { %s2905_s26 = scalar_lea.vmem %s34_s25, 25088  ;;  %p2910_p1 = scmp.lt.s32.totalorder %s34_s25, %s34_s25 }
   0x6   :  { %p2906_p0 = scmp.ne.s32.totalorder %s34_s25, %s2905_s26  ;;  %p2911_p2 = scmp.lt.s32.totalorder %s2905_s26, %s2905_s26 }
   0x8   :  { %p2912_p3 = por %p2911_p2, %p2910_p1 }
   0xa   :  { %p2913_p4 = pnand %p2912_p3, %p2906_p0 }
   0xc   :  { %2916 = shalt.err (!%p2913_p4)
}
   0xd   :  { %s3026_s27 = smov 256   ;;  %s3027_s28 = smov 16  }
   0xe   :  { %39 = dma.hbm_to_vmem [thread:$0]  %s3157_s1, 25088, %s34_s25, [#allocation6], %s3026_s27, %s3026_s27, %s3027_s28  }
   0xf   :  { %s3028_s8 = smov [#allocation8]  }
  0x10   :  { %s55_s9 = sshll.u32 %s3028_s8, 4  ;;  %s56_s9 = int_to_ptr.vmem [resolvable:$true] %s55_s9 }
  0x11   :  { %s2925_s10 = scalar_lea.vmem %s56_s9, 4096  ;;  %p2930_p6 = scmp.lt.s32.totalorder %s56_s9, %s56_s9 }
  0x12   :  { %p2926_p5 = scmp.ne.s32.totalorder %s56_s9, %s2925_s10  ;;  %p2931_p7 = scmp.lt.s32.totalorder %s2925_s10, %s2925_s10 }
  0x14   :  { %p2932_p8 = por %p2931_p7, %p2930_p6 }
  0x16   :  { %p2933_p9 = pnand %p2932_p8, %p2926_p5 }
  0x18   :  { %2936 = shalt.err (!%p2933_p9)
}
  0x19   :  { %s3029_s11 = smov 64   ;;  %s3030_s12 = smov 4  }
  0x1a   :  { %61 = dma.hbm_to_vmem [thread:$0]  %s3159_s3, 4096, %s56_s9, [#allocation9], %s3029_s11, %s3029_s11, %s3030_s12  }
  0x1b   :  { %s3031_s1 = smov [#allocation2]  }
  0x1c   :  { %s21_s15 = sshll.u32 %s3031_s1, 4  ;;  %s22_s15 = int_to_ptr.vmem [resolvable:$true] %s21_s15 }
  0x1d   :  { %s2945_s16 = scalar_lea.vmem %s22_s15, 1792  ;;  %p2950_p11 = scmp.lt.s32.totalorder %s22_s15, %s22_s15 }
  0x1e   :  { %p2946_p10 = scmp.ne.s32.totalorder %s22_s15, %s2945_s16  ;;  %p2951_p12 = scmp.lt.s32.totalorder %s2945_s16, %s2945_s16 }
  0x20   :  { %p2952_p13 = por %p2951_p12, %p2950_p11 }
  0x22   :  { %p2953_p0 = pnand %p2952_p13, %p2946_p10 }
  0x24   :  { %2956 = shalt.err (!%p2953_p0)
}
  0x25   :  { %s3032_s17 = smov 896   ;;  %s3033_s18 = smov 56  }
  0x26   :  { %27 = dma.hbm_to_vmem [thread:$0]  %s3156_s0, 1792, %s22_s15, [#allocation3], %s3032_s17, %s3032_s17, %s3033_s18  }
  0x27   :  { %s3034_s21 = smov [#allocation7]   ;;  %s3035_s3 = smov [#allocation10]  }
  0x28   :  { %s46_s22 = sshll.u32 %s3034_s21, 4  ;;  %s69_s23 = sshll.u32 %s3035_s3, 4  ;;  %s47_s22 = int_to_ptr.vmem [resolvable:$true] %s46_s22  ;;  %s70_s23 = int_to_ptr.vmem [resolvable:$true] %s69_s23 }
  0x29   :  { %s2965_s24 = scalar_lea.vmem %s47_s22, 64  ;;  %p2970_p2 = scmp.lt.s32.totalorder %s47_s22, %s47_s22 }
  0x2a   :  { %p2966_p1 = scmp.ne.s32.totalorder %s47_s22, %s2965_s24  ;;  %p2971_p3 = scmp.lt.s32.totalorder %s2965_s24, %s2965_s24 }
  0x2c   :  { %p2972_p4 = por %p2971_p3, %p2970_p2 }
  0x2e   :  { %p2973_p5 = pnand %p2972_p4, %p2966_p1 }
  0x30   :  { %2976 = shalt.err (!%p2973_p5)
}
  0x31   :  { %49 = dma.hbm_to_vmem [thread:$0]  %s3158_s2, 64, %s47_s22, [#allocation6]  }
  0x32   :  { %s2985_s27 = scalar_lea.vmem %s70_s23, 1024  ;;  %p2990_p7 = scmp.lt.s32.totalorder %s70_s23, %s70_s23 }
  0x33   :  { %p2986_p6 = scmp.ne.s32.totalorder %s70_s23, %s2985_s27  ;;  %p2991_p8 = scmp.lt.s32.totalorder %s2985_s27, %s2985_s27 }
  0x35   :  { %p2992_p9 = por %p2991_p8, %p2990_p7 }
  0x37   :  { %p2993_p10 = pnand %p2992_p9, %p2986_p6 }
  0x39   :  { %2996 = shalt.err (!%p2993_p10)
}
  0x3a   :  { %75 = dma.hbm_to_vmem [thread:$0]  %s3161_s5, 1024, %s70_s23, [#allocation9], %s3029_s11, %s3029_s11, %s3030_s12  }
  0x3b   :  { %3017 = dma.done.wait [#allocation3], 1792  }
  0x3c   :  { %3018 = vsyncadd [#allocation3], 4294965504 }
  0x3d   :  { %3019 = dma.done.wait [#allocation6], 25152  }
  0x3e   :  { %3020 = vsyncadd [#allocation6], 4294942144 }
  0x3f   :  { %3021 = dma.done.wait [#allocation9], 5120  }
  0x40   :  { %3022 = vsyncadd [#allocation9], 4294962176  ;;  %v2535_v0 = vld [vmem:[#allocation5 + $0xe4] ss:$16 sps:$4 sm:$0xff]   ;;  %v2539_v2 = vld [vmem:[#allocation5 + $0xe0] ss:$16 sps:$4 sm:$0xff]  }
  0x41   :  { %v2537_v1 = vld [vmem:[#allocation5 + $0x2e4] ss:$16 sps:$4 sm:$0xff]   ;;  %1318 = vmatprep.subr.bf16.mxu0 %v2535_v0  ;;  %v2540_v3 = vld [vmem:[#allocation5 + $0x2e0] ss:$16 sps:$4 sm:$0xff]   ;;  %v96_v46 = vld [vmem:[#allocation2 + $0x8] sm:$0xff]  ;;  %vm1314_vm0 = vcmask 130048  }
  0x42   :  { %1361 = vmatprep.subr.bf16.mxu1 %v2537_v1  ;;  %v2541_v4 = vld [vmem:[#allocation5 + $0xc4] ss:$16 sps:$4 sm:$0xff]   ;;  %1319 = vmatpush1.bf16.msra.mxu0 %v2539_v2  ;;  %v2545_v6 = vld [vmem:[#allocation5 + $0xc0] ss:$16 sps:$4 sm:$0xff]   ;;  %v98_v48 = vld [vmem:[#allocation2 + $0x18] sm:$0xff]  ;;  %vm3038_vm1 = vmmov 0  }
  0x43   :  { %1362 = vmatpush1.bf16.msra.mxu1 %v2540_v3  ;;  %v2543_v5 = vld [vmem:[#allocation5 + $0x2c4] ss:$16 sps:$4 sm:$0xff]   ;;  %1320 = vmatprep.subr.bf16.mxu0 %v2541_v4  ;;  %v2546_v7 = vld [vmem:[#allocation5 + $0x2c0] ss:$16 sps:$4 sm:$0xff]  }
  0x44   :  { %1363 = vmatprep.subr.bf16.mxu1 %v2543_v5  ;;  %v2547_v8 = vld [vmem:[#allocation5 + $0xa4] ss:$16 sps:$4 sm:$0xff]   ;;  %v2551_v10 = vld [vmem:[#allocation5 + $0xa0] ss:$16 sps:$4 sm:$0xff]  }
  0x45   :  { %v2549_v9 = vld [vmem:[#allocation5 + $0x2a4] ss:$16 sps:$4 sm:$0xff]   ;;  %v2552_v11 = vld [vmem:[#allocation5 + $0x2a0] ss:$16 sps:$4 sm:$0xff]  }
  0x46   :  { %1321 = vmatpush1.bf16.msra.mxu0 %v2545_v6  ;;  %v2553_v12 = vld [vmem:[#allocation5 + $0x84] ss:$16 sps:$4 sm:$0xff]   ;;  %v2557_v14 = vld [vmem:[#allocation5 + $0x80] ss:$16 sps:$4 sm:$0xff]  }
  0x47   :  { %1364 = vmatpush1.bf16.msra.mxu1 %v2546_v7  ;;  %1322 = vmatprep.subr.bf16.mxu0 %v2547_v8  ;;  %v2555_v13 = vld [vmem:[#allocation5 + $0x284] ss:$16 sps:$4 sm:$0xff]   ;;  %v2558_v15 = vld [vmem:[#allocation5 + $0x280] ss:$16 sps:$4 sm:$0xff]   ;;  %v102_v7 = vld [vmem:[#allocation2 + $0x38] sm:$0xff] }
  0x48   :  { %1365 = vmatprep.subr.bf16.mxu1 %v2549_v9  ;;  %v2559_v16 = vld [vmem:[#allocation5 + $0x64] ss:$16 sps:$4 sm:$0xff]   ;;  %v2563_v18 = vld [vmem:[#allocation5 + $0x60] ss:$16 sps:$4 sm:$0xff]   ;;  %v104_v9 = vld [vmem:[#allocation2 + $0x48] sm:$0xff] }
  0x49   :  { %v2561_v17 = vld [vmem:[#allocation5 + $0x264] ss:$16 sps:$4 sm:$0xff]   ;;  %v2564_v19 = vld [vmem:[#allocation5 + $0x260] ss:$16 sps:$4 sm:$0xff]  }
  0x4a   :  { %1323 = vmatpush1.bf16.msra.mxu0 %v2551_v10  ;;  %v2565_v20 = vld [vmem:[#allocation5 + $0x44] ss:$16 sps:$4 sm:$0xff]   ;;  %v2569_v22 = vld [vmem:[#allocation5 + $0x40] ss:$16 sps:$4 sm:$0xff]  }
  0x4b   :  { %1366 = vmatpush1.bf16.msra.mxu1 %v2552_v11  ;;  %1324 = vmatprep.subr.bf16.mxu0 %v2553_v12  ;;  %v2567_v21 = vld [vmem:[#allocation5 + $0x244] ss:$16 sps:$4 sm:$0xff]   ;;  %v2570_v23 = vld [vmem:[#allocation5 + $0x240] ss:$16 sps:$4 sm:$0xff]  }
  0x4c   :  { %1367 = vmatprep.subr.bf16.mxu1 %v2555_v13  ;;  %v2571_v24 = vld [vmem:[#allocation5 + $0x24] ss:$16 sps:$4 sm:$0xff]   ;;  %v2575_v26 = vld [vmem:[#allocation5 + $0x20] ss:$16 sps:$4 sm:$0xff]  }
  0x4d   :  { %v2573_v25 = vld [vmem:[#allocation5 + $0x224] ss:$16 sps:$4 sm:$0xff]   ;;  %v2576_v27 = vld [vmem:[#allocation5 + $0x220] ss:$16 sps:$4 sm:$0xff]  }
  0x4e   :  { %1325 = vmatpush1.bf16.msra.mxu0 %v2557_v14  ;;  %v2577_v28 = vld [vmem:[#allocation5 + $0x4] ss:$16 sps:$4 sm:$0xff]   ;;  %v2581_v30 = vld [vmem:[#allocation5] ss:$16 sps:$4 sm:$0xff]  }
  0x4f   :  { %1368 = vmatpush1.bf16.msra.mxu1 %v2558_v15  ;;  %1326 = vmatprep.subr.bf16.mxu0 %v2559_v16  ;;  %v2579_v29 = vld [vmem:[#allocation5 + $0x204] ss:$16 sps:$4 sm:$0xff]   ;;  %v2582_v31 = vld [vmem:[#allocation5 + $0x200] ss:$16 sps:$4 sm:$0xff]  }
  0x50   :  { %1369 = vmatprep.subr.bf16.mxu1 %v2561_v17  ;;  %v2583_v32 = vld [vmem:[#allocation5 + $0x1e4] ss:$16 sps:$4 sm:$0xff]   ;;  %v2587_v34 = vld [vmem:[#allocation5 + $0x1e0] ss:$16 sps:$4 sm:$0xff]   ;;  %v2642_v17 = vld [vmem:[#allocation5 + $0xec] ss:$16 sps:$4 sm:$0xff]  }
  0x51   :  { %v2585_v33 = vld [vmem:[#allocation5 + $0x3e4] ss:$16 sps:$4 sm:$0xff]   ;;  %v2588_v35 = vld [vmem:[#allocation5 + $0x3e0] ss:$16 sps:$4 sm:$0xff]  }
  0x52   :  { %1327 = vmatpush1.bf16.msra.mxu0 %v2563_v18  ;;  %v2589_v36 = vld [vmem:[#allocation5 + $0x1c4] ss:$16 sps:$4 sm:$0xff]   ;;  %v2593_v38 = vld [vmem:[#allocation5 + $0x1c0] ss:$16 sps:$4 sm:$0xff]  }
  0x53   :  { %1370 = vmatpush1.bf16.msra.mxu1 %v2564_v19  ;;  %1328 = vmatprep.subr.bf16.mxu0 %v2565_v20  ;;  %v2591_v37 = vld [vmem:[#allocation5 + $0x3c4] ss:$16 sps:$4 sm:$0xff]   ;;  %v2594_v39 = vld [vmem:[#allocation5 + $0x3c0] ss:$16 sps:$4 sm:$0xff]   ;;  %v108_v20 = vld [vmem:[#allocation2 + $0x68] sm:$0xff] }
  0x54   :  { %1371 = vmatprep.subr.bf16.mxu1 %v2567_v21  ;;  %v2595_v40 = vld [vmem:[#allocation5 + $0x1a4] ss:$16 sps:$4 sm:$0xff]   ;;  %v2599_v42 = vld [vmem:[#allocation5 + $0x1a0] ss:$16 sps:$4 sm:$0xff]   ;;  %v3036_v21 = vmov 0  }
  0x55   :  { %v2597_v41 = vld [vmem:[#allocation5 + $0x3a4] ss:$16 sps:$4 sm:$0xff]   ;;  %v2600_v43 = vld [vmem:[#allocation5 + $0x3a0] ss:$16 sps:$4 sm:$0xff]  }
  0x56   :  { %1329 = vmatpush1.bf16.msra.mxu0 %v2569_v22  ;;  %v2601_v44 = vld [vmem:[#allocation5 + $0x184] ss:$16 sps:$4 sm:$0xff]   ;;  %v2605_v50 = vld [vmem:[#allocation5 + $0x180] ss:$16 sps:$4 sm:$0xff]  }
  0x57   :  { %1372 = vmatpush1.bf16.msra.mxu1 %v2570_v23  ;;  %1330 = vmatprep.subr.bf16.mxu0 %v2571_v24  ;;  %v2603_v45 = vld [vmem:[#allocation5 + $0x384] ss:$16 sps:$4 sm:$0xff]   ;;  %v2606_v51 = vld [vmem:[#allocation5 + $0x380] ss:$16 sps:$4 sm:$0xff]   ;;  %v2640_v24 = vld [vmem:[#allocation5 + $0xe8] ss:$16 sps:$4 sm:$0xff]  }
  0x58   :  { %1373 = vmatprep.subr.bf16.mxu1 %v2573_v25  ;;  %v103_v47 = vld [vmem:[#allocation2 + $0x40] sm:$0xff]  ;;  %v105_v49 = vld [vmem:[#allocation2 + $0x50] sm:$0xff] }
  0x59   :  { %v2607_v52 = vld [vmem:[#allocation5 + $0x164] ss:$16 sps:$4 sm:$0xff]   ;;  %v3103_v53 = vpack.c.bf16 %v103_v47, %v96_v46  ;;  %v3105_v54 = vpack.c.bf16 %v105_v49, %v98_v48  ;;  %v2611_v56 = vld [vmem:[#allocation5 + $0x160] ss:$16 sps:$4 sm:$0xff]   ;;  %v2670_v47 = vld [vmem:[#allocation5 + $0x48] ss:$16 sps:$4 sm:$0xff]  }
  0x5a   :  { %1331 = vmatpush1.bf16.msra.mxu0 %v2575_v26  ;;  %v2609_v55 = vld [vmem:[#allocation5 + $0x364] ss:$16 sps:$4 sm:$0xff]   ;;  %v2612_v57 = vld [vmem:[#allocation5 + $0x360] ss:$16 sps:$4 sm:$0xff]   ;;  %v2648_v26 = vld [vmem:[#allocation5 + $0xcc] ss:$16 sps:$4 sm:$0xff]  }
  0x5b   :  { %1374 = vmatpush1.bf16.msra.mxu1 %v2576_v27  ;;  %1332 = vmatprep.subr.bf16.mxu0 %v2577_v28  ;;  %v2613_v58 = vld [vmem:[#allocation5 + $0x144] ss:$16 sps:$4 sm:$0xff]   ;;  %v2617_v60 = vld [vmem:[#allocation5 + $0x140] ss:$16 sps:$4 sm:$0xff]   ;;  %v2646_v28 = vld [vmem:[#allocation5 + $0xc8] ss:$16 sps:$4 sm:$0xff]  }
  0x5c   :  { %1375 = vmatprep.subr.bf16.mxu1 %v2579_v29  ;;  %1350 = vmatprep.mubr.bf16.mxu0 %v3103_v53  ;;  %v2615_v59 = vld [vmem:[#allocation5 + $0x344] ss:$16 sps:$4 sm:$0xff]   ;;  %v2618_v61 = vld [vmem:[#allocation5 + $0x340] ss:$16 sps:$4 sm:$0xff]   ;;  %v2678_v49 = vld [vmem:[#allocation5 + $0x2c] ss:$16 sps:$4 sm:$0xff]  }
  0x5d   :  { %1393 = vmatprep.mubr.bf16.mxu1 %v3105_v54  ;;  %v2619_v62 = vld [vmem:[#allocation5 + $0x124] ss:$16 sps:$4 sm:$0xff]   ;;  %v2623_v0 = vld [vmem:[#allocation5 + $0x120] ss:$16 sps:$4 sm:$0xff]  }
  0x5e   :  { %1333 = vmatpush1.bf16.msra.mxu0 %v2581_v30  ;;  %v2621_v63 = vld [vmem:[#allocation5 + $0x324] ss:$16 sps:$4 sm:$0xff]   ;;  %v2624_v1 = vld [vmem:[#allocation5 + $0x320] ss:$16 sps:$4 sm:$0xff]   ;;  %v2654_v30 = vld [vmem:[#allocation5 + $0xac] ss:$16 sps:$4 sm:$0xff]  }
  0x5f   :  { %1376 = vmatpush1.bf16.msra.mxu1 %v2582_v31  ;;  %1334 = vmatprep.subr.bf16.mxu0 %v2583_v32  ;;  %v2625_v2 = vld [vmem:[#allocation5 + $0x104] ss:$16 sps:$4 sm:$0xff]   ;;  %v2629_v4 = vld [vmem:[#allocation5 + $0x100] ss:$16 sps:$4 sm:$0xff]   ;;  %v2652_v32 = vld [vmem:[#allocation5 + $0xa8] ss:$16 sps:$4 sm:$0xff]  }
  0x60   :  { %1377 = vmatprep.subr.bf16.mxu1 %v2585_v33  ;;  %v2627_v3 = vld [vmem:[#allocation5 + $0x304] ss:$16 sps:$4 sm:$0xff]   ;;  %v2630_v5 = vld [vmem:[#allocation5 + $0x300] ss:$16 sps:$4 sm:$0xff]  }
  0x61   :  { %v95_v6 = vld [vmem:[#allocation2] sm:$0xff]  ;;  %v97_v8 = vld [vmem:[#allocation2 + $0x10] sm:$0xff] }
  0x62   :  { %1335 = vmatpush2.bf16.msra.mxu0 %v2587_v34  ;;  %v2633_v10 = vld [vmem:[#allocation5 + $0x4e4] ss:$16 sps:$4 sm:$0xff]   ;;  %v3109_v12 = vpack.c.bf16 %v102_v7, %v95_v6  ;;  %v3111_v13 = vpack.c.bf16 %v104_v9, %v97_v8  ;;  %v2631_v14 = vld [vmem:[#allocation5 + $0x4e0] ss:$16 sps:$4 sm:$0xff]   ;;  %v2660_v34 = vld [vmem:[#allocation5 + $0x8c] ss:$16 sps:$4 sm:$0xff]  }
  0x63   :  { %1378 = vmatpush2.bf16.msra.mxu1 %v2588_v35  ;;  %1336 = vmatprep.subr.bf16.mxu0 %v2589_v36  ;;  %v2636_v11 = vld [vmem:[#allocation5 + $0x604] ss:$16 sps:$4 sm:$0xff]   ;;  %v2634_v15 = vld [vmem:[#allocation5 + $0x600] ss:$16 sps:$4 sm:$0xff]   ;;  %v2658_v36 = vld [vmem:[#allocation5 + $0x88] ss:$16 sps:$4 sm:$0xff]  }
  0x64   :  { %1379 = vmatprep.subr.bf16.mxu1 %v2591_v37  ;;  %v2639_v16 = vld [vmem:[#allocation5 + $0x4c4] ss:$16 sps:$4 sm:$0xff]   ;;  %v2637_v18 = vld [vmem:[#allocation5 + $0x4c0] ss:$16 sps:$4 sm:$0xff]   ;;  %v2708_v6 = vld [vmem:[#allocation5 + $0x18c] ss:$16 sps:$4 sm:$0xff]  }
  0x65   :  { %v101_v19 = vld [vmem:[#allocation2 + $0x30] sm:$0xff]  ;;  %v2706_v8 = vld [vmem:[#allocation5 + $0x188] ss:$16 sps:$4 sm:$0xff]  }
  0x66   :  { %1337 = vmatpush2.bf16.msra.mxu0 %v2593_v38  ;;  %v2645_v22 = vld [vmem:[#allocation5 + $0x4a4] ss:$16 sps:$4 sm:$0xff]   ;;  %v3116_v23 = vpack.c.bf16 %v108_v20, %v101_v19  ;;  %v2643_v25 = vld [vmem:[#allocation5 + $0x4a0] ss:$16 sps:$4 sm:$0xff]   ;;  %v2666_v38 = vld [vmem:[#allocation5 + $0x6c] ss:$16 sps:$4 sm:$0xff]  }
  0x67   :  { %1380 = vmatpush2.bf16.msra.mxu1 %v2594_v39  ;;  %1338 = vmatprep.subr.bf16.mxu0 %v2595_v40  ;;  %v2651_v27 = vld [vmem:[#allocation5 + $0x484] ss:$16 sps:$4 sm:$0xff]   ;;  %v2649_v29 = vld [vmem:[#allocation5 + $0x480] ss:$16 sps:$4 sm:$0xff]   ;;  %v2664_v40 = vld [vmem:[#allocation5 + $0x68] ss:$16 sps:$4 sm:$0xff]  }
  0x68   :  { %1381 = vmatprep.subr.bf16.mxu1 %v2597_v41  ;;  %v2657_v31 = vld [vmem:[#allocation5 + $0x464] ss:$16 sps:$4 sm:$0xff]   ;;  %v2655_v33 = vld [vmem:[#allocation5 + $0x460] ss:$16 sps:$4 sm:$0xff]   ;;  %v100_v41 = vld [vmem:[#allocation2 + $0x28] sm:$0xff] }
  0x69   :  { %v2663_v35 = vld [vmem:[#allocation5 + $0x444] ss:$16 sps:$4 sm:$0xff]   ;;  %v2661_v37 = vld [vmem:[#allocation5 + $0x440] ss:$16 sps:$4 sm:$0xff]  }
  0x6a   :  { %1339 = vmatpush2.bf16.msra.mxu0 %v2599_v42  ;;  %v2669_v39 = vld [vmem:[#allocation5 + $0x424] ss:$16 sps:$4 sm:$0xff]   ;;  %v2673_v48 = vld [vmem:[#allocation5 + $0x400] ss:$16 sps:$4 sm:$0xff]  }
  0x6b   :  { %1382 = vmatpush2.bf16.msra.mxu1 %v2600_v43  ;;  %1340 = vmatprep.subr.bf16.mxu0 %v2601_v44  ;;  %v107_v42 = vld [vmem:[#allocation2 + $0x60] sm:$0xff] }
  0x6c   :  { %1383 = vmatprep.subr.bf16.mxu1 %v2603_v45  ;;  %v2667_v43 = vld [vmem:[#allocation5 + $0x420] ss:$16 sps:$4 sm:$0xff]   ;;  %v3121_v44 = vpack.c.bf16 %v107_v42, %v100_v41  ;;  %v2672_v45 = vld [vmem:[#allocation5 + $0x4c] ss:$16 sps:$4 sm:$0xff]   ;;  %v2675_v46 = vld [vmem:[#allocation5 + $0x404] ss:$16 sps:$4 sm:$0xff]  }
  0x6d   :  { %v2711_v7 = vld [vmem:[#allocation5 + $0x544] ss:$16 sps:$4 sm:$0xff]   ;;  %v2709_v9 = vld [vmem:[#allocation5 + $0x540] ss:$16 sps:$4 sm:$0xff]   ;;  %v2750_v41 = vld [vmem:[#allocation5 + $0x4ac] ss:$16 sps:$4 sm:$0xff]  }
  0x6e   :  { %1341 = vmatpush2.bf16.msra.mxu0 %v2605_v50  ;;  %v2681_v50 = vld [vmem:[#allocation5 + $0x5e4] ss:$16 sps:$4 sm:$0xff]   ;;  %v2721_v19 = vld [vmem:[#allocation5 + $0x500] ss:$16 sps:$4 sm:$0xff]   ;;  %v2753_v42 = vld [vmem:[#allocation5 + $0x26c] ss:$16 sps:$4 sm:$0xff]  }
  0x6f   :  { %1384 = vmatpush2.bf16.msra.mxu1 %v2606_v51  ;;  %1342 = vmatprep.subr.bf16.mxu0 %v2607_v52  ;;  %v2676_v51 = vld [vmem:[#allocation5 + $0x28] ss:$16 sps:$4 sm:$0xff]   ;;  %v2679_v52 = vld [vmem:[#allocation5 + $0x5e0] ss:$16 sps:$4 sm:$0xff]  }
  0x70   :  { %1385 = vmatprep.subr.bf16.mxu1 %v2609_v55  ;;  %v2687_v55 = vld [vmem:[#allocation5 + $0x5c4] ss:$16 sps:$4 sm:$0xff]  }
  0x71   :  { %v99_v20 = vld [vmem:[#allocation2 + $0x20] sm:$0xff] }
  0x72   :  { %1343 = vmatpush2.bf16.msra.mxu0 %v2611_v56  ;;  %v2682_v56 = vld [vmem:[#allocation5 + $0x8] ss:$16 sps:$4 sm:$0xff]  }
  0x73   :  { %1386 = vmatpush2.bf16.msra.mxu1 %v2612_v57  ;;  %1344 = vmatprep.subr.bf16.mxu0 %v2613_v58  ;;  %v2685_v57 = vld [vmem:[#allocation5 + $0x5c0] ss:$16 sps:$4 sm:$0xff]   ;;  %v2690_v58 = vld [vmem:[#allocation5 + $0x1ec] ss:$16 sps:$4 sm:$0xff]  }
  0x74   :  { %1387 = vmatprep.subr.bf16.mxu1 %v2615_v59  ;;  %v2693_v59 = vld [vmem:[#allocation5 + $0x5a4] ss:$16 sps:$4 sm:$0xff]  }
  0x76   :  { %1345 = vmatpush2.bf16.msra.mxu0 %v2617_v60  ;;  %v2688_v60 = vld [vmem:[#allocation5 + $0x1e8] ss:$16 sps:$4 sm:$0xff]  }
  0x77   :  { %1388 = vmatpush2.bf16.msra.mxu1 %v2618_v61  ;;  %1346 = vmatprep.subr.bf16.mxu0 %v2619_v62  ;;  %v2691_v61 = vld [vmem:[#allocation5 + $0x5a0] ss:$16 sps:$4 sm:$0xff]   ;;  %v2696_v62 = vld [vmem:[#allocation5 + $0x1cc] ss:$16 sps:$4 sm:$0xff]  }
  0x78   :  { %1389 = vmatprep.subr.bf16.mxu1 %v2621_v63  ;;  %v2699_v63 = vld [vmem:[#allocation5 + $0x584] ss:$16 sps:$4 sm:$0xff]  }
  0x7a   :  { %1347 = vmatpush2.bf16.msra.mxu0 %v2623_v0  ;;  %v2694_v0 = vld [vmem:[#allocation5 + $0x1c8] ss:$16 sps:$4 sm:$0xff]  }
  0x7b   :  { %1390 = vmatpush2.bf16.msra.mxu1 %v2624_v1  ;;  %1348 = vmatprep.subr.bf16.mxu0 %v2625_v2  ;;  %v2697_v1 = vld [vmem:[#allocation5 + $0x580] ss:$16 sps:$4 sm:$0xff]   ;;  %v2702_v2 = vld [vmem:[#allocation5 + $0x1ac] ss:$16 sps:$4 sm:$0xff]  }
  0x7c   :  { %1391 = vmatprep.subr.bf16.mxu1 %v2627_v3  ;;  %v2705_v3 = vld [vmem:[#allocation5 + $0x564] ss:$16 sps:$4 sm:$0xff]  }
  0x7e   :  { %1349 = vmatpush2.bf16.msra.mxu0 %v2629_v4  ;;  %v2700_v4 = vld [vmem:[#allocation5 + $0x1a8] ss:$16 sps:$4 sm:$0xff]  }
  0x7f   :  { %1392 = vmatpush2.bf16.msra.mxu1 %v2630_v5  ;;  %1404 = vmatprep.subr.bf16.mxu0 %v2633_v10  ;;  %v2703_v5 = vld [vmem:[#allocation5 + $0x560] ss:$16 sps:$4 sm:$0xff]   ;;  %v2714_v10 = vld [vmem:[#allocation5 + $0x16c] ss:$16 sps:$4 sm:$0xff]  }
  0x80   :  { %1461 = vmatprep.subr.bf16.mxu1 %v2636_v11  ;;  %v2717_v11 = vld [vmem:[#allocation5 + $0x524] ss:$16 sps:$4 sm:$0xff]  }
  0x81   :  { %1351 = vmatmul.mubr.bf16.vlgmr.msra.gmra.mxu0 %v3109_v12 }
  0x82   :  { %1394 = vmatmul.mubr.bf16.vlgmr.msra.gmra.mxu1 %v3111_v13  ;;  %1405 = vmatpush1.bf16.msra.mxu0 %v2631_v14  ;;  %v2712_v14 = vld [vmem:[#allocation5 + $0x168] ss:$16 sps:$4 sm:$0xff]  }
  0x83   :  { %1462 = vmatpush1.bf16.msra.mxu1 %v2634_v15  ;;  %1406 = vmatprep.subr.bf16.mxu0 %v2639_v16  ;;  %v2715_v15 = vld [vmem:[#allocation5 + $0x520] ss:$16 sps:$4 sm:$0xff]   ;;  %v2720_v16 = vld [vmem:[#allocation5 + $0x14c] ss:$16 sps:$4 sm:$0xff]  }
  0x84   :  { %1479 = vmatprep.mubr.bf16.mxu1 %v3036_v21  ;;  %1490 = vmatprep.subr.bf16.mxu1 %v2642_v17  ;;  %v2723_v17 = vld [vmem:[#allocation5 + $0x504] ss:$16 sps:$4 sm:$0xff]  }
  0x85   :  { %1436 = vmatprep.mubr.bf16.mxu0 %v3121_v44 }
  0x86   :  { %1407 = vmatpush1.bf16.msra.mxu0 %v2637_v18  ;;  %v2718_v18 = vld [vmem:[#allocation5 + $0x148] ss:$16 sps:$4 sm:$0xff]  }
  0x87   :  { %1408 = vmatprep.subr.bf16.mxu0 %v2645_v22  ;;  %v106_v22 = vld [vmem:[#allocation2 + $0x58] sm:$0xff] }
  0x8a   :  { %2396 = vmatmul.mubr.msk.bf16.vlgmr.msra.gmra.mxu1 %vm1314_vm0, %v3116_v23  ;;  %1409 = vmatpush1.bf16.msra.mxu0 %v2643_v25  ;;  %v2729_v25 = vld [vmem:[#allocation5 + $0x2ec] ss:$16 sps:$4 sm:$0xff]  }
  0x8b   :  { %1491 = vmatpush1.bf16.msra.mxu1 %v2640_v24  ;;  %1410 = vmatprep.subr.bf16.mxu0 %v2651_v27  ;;  %v2726_v24 = vld [vmem:[#allocation5 + $0x12c] ss:$16 sps:$4 sm:$0xff]   ;;  %v2724_v27 = vld [vmem:[#allocation5 + $0x128] ss:$16 sps:$4 sm:$0xff]  }
  0x8c   :  { %1492 = vmatprep.subr.bf16.mxu1 %v2648_v26  ;;  %1522 = vmatprep.mubr.bf16.mxu1 %v3103_v53  ;;  %v2684_v53 = vld [vmem:[#allocation5 + $0xc] ss:$16 sps:$4 sm:$0xff]   ;;  %v3124_v26 = vpack.c.bf16 %v106_v22, %v99_v20  ;;  %v2808_v20 = vld [vmem:[#allocation5 + $0x568] ss:$16 sps:$4 sm:$0xff]  }
  0x8d   :  { %v2811_v22 = vld [vmem:[#allocation5 + $0x328] ss:$16 sps:$4 sm:$0xff]  }
  0x8e   :  { %1411 = vmatpush1.bf16.msra.mxu0 %v2649_v29  ;;  %v2732_v29 = vld [vmem:[#allocation5 + $0x10c] ss:$16 sps:$4 sm:$0xff]  }
  0x8f   :  { %1493 = vmatpush1.bf16.msra.mxu1 %v2646_v28  ;;  %1412 = vmatprep.subr.bf16.mxu0 %v2657_v31  ;;  %v2727_v28 = vld [vmem:[#allocation5 + $0x2e8] ss:$16 sps:$4 sm:$0xff]  }
  0x90   :  { %1494 = vmatprep.subr.bf16.mxu1 %v2654_v30  ;;  %v2735_v30 = vld [vmem:[#allocation5 + $0x2cc] ss:$16 sps:$4 sm:$0xff]   ;;  %v2730_v31 = vld [vmem:[#allocation5 + $0x108] ss:$16 sps:$4 sm:$0xff]  }
  0x92   :  { %1413 = vmatpush1.bf16.msra.mxu0 %v2655_v33  ;;  %v2738_v33 = vld [vmem:[#allocation5 + $0x4ec] ss:$16 sps:$4 sm:$0xff]  }
  0x93   :  { %1495 = vmatpush1.bf16.msra.mxu1 %v2652_v32  ;;  %1414 = vmatprep.subr.bf16.mxu0 %v2663_v35  ;;  %v2733_v32 = vld [vmem:[#allocation5 + $0x2c8] ss:$16 sps:$4 sm:$0xff]  }
  0x94   :  { %1496 = vmatprep.subr.bf16.mxu1 %v2660_v34  ;;  %v2741_v34 = vld [vmem:[#allocation5 + $0x2ac] ss:$16 sps:$4 sm:$0xff]   ;;  %v2736_v35 = vld [vmem:[#allocation5 + $0x4e8] ss:$16 sps:$4 sm:$0xff]  }
  0x96   :  { %1415 = vmatpush1.bf16.msra.mxu0 %v2661_v37  ;;  %v2744_v37 = vld [vmem:[#allocation5 + $0x4cc] ss:$16 sps:$4 sm:$0xff]  }
  0x97   :  { %1497 = vmatpush1.bf16.msra.mxu1 %v2658_v36  ;;  %1416 = vmatprep.subr.bf16.mxu0 %v2669_v39  ;;  %v2739_v36 = vld [vmem:[#allocation5 + $0x2a8] ss:$16 sps:$4 sm:$0xff]  }
  0x98   :  { %1498 = vmatprep.subr.bf16.mxu1 %v2666_v38  ;;  %v2747_v38 = vld [vmem:[#allocation5 + $0x28c] ss:$16 sps:$4 sm:$0xff]   ;;  %v2742_v39 = vld [vmem:[#allocation5 + $0x4c8] ss:$16 sps:$4 sm:$0xff]  }
  0x9a   :  { %1417 = vmatpush1.bf16.msra.mxu0 %v2667_v43  ;;  %v2748_v43 = vld [vmem:[#allocation5 + $0x4a8] ss:$16 sps:$4 sm:$0xff]  }
  0x9b   :  { %1499 = vmatpush1.bf16.msra.mxu1 %v2664_v40  ;;  %1418 = vmatprep.subr.bf16.mxu0 %v2675_v46  ;;  %v2745_v40 = vld [vmem:[#allocation5 + $0x288] ss:$16 sps:$4 sm:$0xff]   ;;  %v2759_v46 = vld [vmem:[#allocation5 + $0x24c] ss:$16 sps:$4 sm:$0xff]  }
  0x9c   :  { %1500 = vmatprep.subr.bf16.mxu1 %v2672_v45  ;;  %v2751_v45 = vld [vmem:[#allocation5 + $0x268] ss:$16 sps:$4 sm:$0xff]  }
  0x9e   :  { %1419 = vmatpush1.bf16.msra.mxu0 %v2673_v48  ;;  %v2757_v48 = vld [vmem:[#allocation5 + $0x248] ss:$16 sps:$4 sm:$0xff]  }
  0x9f   :  { %1501 = vmatpush1.bf16.msra.mxu1 %v2670_v47  ;;  %1420 = vmatprep.subr.bf16.mxu0 %v2681_v50  ;;  %v2754_v47 = vld [vmem:[#allocation5 + $0x488] ss:$16 sps:$4 sm:$0xff]  }
  0xa0   :  { %1502 = vmatprep.subr.bf16.mxu1 %v2678_v49  ;;  %v2762_v49 = vld [vmem:[#allocation5 + $0x46c] ss:$16 sps:$4 sm:$0xff]   ;;  %v2760_v50 = vld [vmem:[#allocation5 + $0x468] ss:$16 sps:$4 sm:$0xff]  }
  0xa2   :  { %1421 = vmatpush2.bf16.msra.mxu0 %v2679_v52  ;;  %v2768_v52 = vld [vmem:[#allocation5 + $0x44c] ss:$16 sps:$4 sm:$0xff]  }
  0xa3   :  { %1503 = vmatpush1.bf16.msra.mxu1 %v2676_v51  ;;  %1422 = vmatprep.subr.bf16.mxu0 %v2687_v55  ;;  %v2763_v51 = vld [vmem:[#allocation5 + $0x228] ss:$16 sps:$4 sm:$0xff]  }
  0xa4   :  { %1504 = vmatprep.subr.bf16.mxu1 %v2684_v53  ;;  %v2771_v53 = vld [vmem:[#allocation5 + $0x20c] ss:$16 sps:$4 sm:$0xff]   ;;  %v2769_v55 = vld [vmem:[#allocation5 + $0x208] ss:$16 sps:$4 sm:$0xff]  }
  0xa6   :  { %1423 = vmatpush2.bf16.msra.mxu0 %v2685_v57  ;;  %v2777_v57 = vld [vmem:[#allocation5 + $0x3ec] ss:$16 sps:$4 sm:$0xff]  }
  0xa7   :  { %1505 = vmatpush1.bf16.msra.mxu1 %v2682_v56  ;;  %1424 = vmatprep.subr.bf16.mxu0 %v2693_v59  ;;  %v2774_v56 = vld [vmem:[#allocation5 + $0x42c] ss:$16 sps:$4 sm:$0xff]   ;;  %v2775_v59 = vld [vmem:[#allocation5 + $0x3e8] ss:$16 sps:$4 sm:$0xff]  }
  0xa8   :  { %1506 = vmatprep.subr.bf16.mxu1 %v2690_v58  ;;  %v2772_v58 = vld [vmem:[#allocation5 + $0x428] ss:$16 sps:$4 sm:$0xff]  }
  0xaa   :  { %1425 = vmatpush2.bf16.msra.mxu0 %v2691_v61  ;;  %v2783_v61 = vld [vmem:[#allocation5 + $0x3cc] ss:$16 sps:$4 sm:$0xff]  }
  0xab   :  { %1507 = vmatpush2.bf16.msra.mxu1 %v2688_v60  ;;  %1426 = vmatprep.subr.bf16.mxu0 %v2699_v63  ;;  %v2780_v60 = vld [vmem:[#allocation5 + $0x40c] ss:$16 sps:$4 sm:$0xff]   ;;  %v2781_v63 = vld [vmem:[#allocation5 + $0x3c8] ss:$16 sps:$4 sm:$0xff]  }
  0xac   :  { %1508 = vmatprep.subr.bf16.mxu1 %v2696_v62  ;;  %v2778_v62 = vld [vmem:[#allocation5 + $0x408] ss:$16 sps:$4 sm:$0xff]  }
  0xae   :  { %1427 = vmatpush2.bf16.msra.mxu0 %v2697_v1  ;;  %v2789_v1 = vld [vmem:[#allocation5 + $0x3ac] ss:$16 sps:$4 sm:$0xff]  }
  0xaf   :  { %1509 = vmatpush2.bf16.msra.mxu1 %v2694_v0  ;;  %1428 = vmatprep.subr.bf16.mxu0 %v2705_v3  ;;  %v2786_v0 = vld [vmem:[#allocation5 + $0x5ec] ss:$16 sps:$4 sm:$0xff]   ;;  %v2787_v3 = vld [vmem:[#allocation5 + $0x3a8] ss:$16 sps:$4 sm:$0xff]  }
  0xb0   :  { %1510 = vmatprep.subr.bf16.mxu1 %v2702_v2  ;;  %v2784_v2 = vld [vmem:[#allocation5 + $0x5e8] ss:$16 sps:$4 sm:$0xff]  }
  0xb2   :  { %1429 = vmatpush2.bf16.msra.mxu0 %v2703_v5  ;;  %v2795_v5 = vld [vmem:[#allocation5 + $0x38c] ss:$16 sps:$4 sm:$0xff]  }
  0xb3   :  { %1511 = vmatpush2.bf16.msra.mxu1 %v2700_v4  ;;  %1430 = vmatprep.subr.bf16.mxu0 %v2711_v7  ;;  %v2792_v4 = vld [vmem:[#allocation5 + $0x5cc] ss:$16 sps:$4 sm:$0xff]   ;;  %v2793_v7 = vld [vmem:[#allocation5 + $0x388] ss:$16 sps:$4 sm:$0xff]  }
  0xb4   :  { %1512 = vmatprep.subr.bf16.mxu1 %v2708_v6  ;;  %v2790_v6 = vld [vmem:[#allocation5 + $0x5c8] ss:$16 sps:$4 sm:$0xff]  }
  0xb6   :  { %1431 = vmatpush2.bf16.msra.mxu0 %v2709_v9  ;;  %v2801_v9 = vld [vmem:[#allocation5 + $0x36c] ss:$16 sps:$4 sm:$0xff]  }
  0xb7   :  { %1513 = vmatpush2.bf16.msra.mxu1 %v2706_v8  ;;  %1432 = vmatprep.subr.bf16.mxu0 %v2717_v11  ;;  %v2798_v8 = vld [vmem:[#allocation5 + $0x5ac] ss:$16 sps:$4 sm:$0xff]   ;;  %v2799_v11 = vld [vmem:[#allocation5 + $0x368] ss:$16 sps:$4 sm:$0xff]  }
  0xb8   :  { %1514 = vmatprep.subr.bf16.mxu1 %v2714_v10  ;;  %v2796_v10 = vld [vmem:[#allocation5 + $0x5a8] ss:$16 sps:$4 sm:$0xff]  }
  0xba   :  { %1433 = vmatpush2.bf16.msra.mxu0 %v2715_v15  ;;  %v2807_v15 = vld [vmem:[#allocation5 + $0x34c] ss:$16 sps:$4 sm:$0xff]  }
  0xbb   :  { %1515 = vmatpush2.bf16.msra.mxu1 %v2712_v14  ;;  %1434 = vmatprep.subr.bf16.mxu0 %v2723_v17  ;;  %v2804_v14 = vld [vmem:[#allocation5 + $0x58c] ss:$16 sps:$4 sm:$0xff]   ;;  %v2805_v17 = vld [vmem:[#allocation5 + $0x348] ss:$16 sps:$4 sm:$0xff]  }
  0xbc   :  { %1516 = vmatprep.subr.bf16.mxu1 %v2720_v16  ;;  %v2802_v16 = vld [vmem:[#allocation5 + $0x588] ss:$16 sps:$4 sm:$0xff]  }
  0xbe   :  { %1435 = vmatpush2.bf16.msra.mxu0 %v2721_v19  ;;  %v2813_v19 = vld [vmem:[#allocation5 + $0x32c] ss:$16 sps:$4 sm:$0xff]  }
  0xbf   :  { %1517 = vmatpush2.bf16.msra.mxu1 %v2718_v18  ;;  %1533 = vmatprep.subr.bf16.mxu0 %v2729_v25  ;;  %v2810_v18 = vld [vmem:[#allocation5 + $0x56c] ss:$16 sps:$4 sm:$0xff]  }
  0xc0   :  { %1518 = vmatprep.subr.bf16.mxu1 %v2726_v24  ;;  %v2816_v24 = vld [vmem:[#allocation5 + $0x54c] ss:$16 sps:$4 sm:$0xff]  }
  0xc1   :  { %1437 = vmatmul.mubr.bf16.vlgmr.msra.gmra.mxu0 %v3124_v26  ;;  %v2819_v25 = vld [vmem:[#allocation5 + $0x30c] ss:$16 sps:$4 sm:$0xff]  }
  0xc2   :  { %1534 = vmatpush1.bf16.msra.mxu0 %v2727_v28  ;;  %1565 = vmatprep.mubr.bf16.mxu0 %v3105_v54  ;;  %v2756_v54 = vld [vmem:[#allocation5 + $0x48c] ss:$16 sps:$4 sm:$0xff]   ;;  %v2817_v28 = vld [vmem:[#allocation5 + $0x308] ss:$16 sps:$4 sm:$0xff]  }
  0xc3   :  { %1519 = vmatpush2.bf16.msra.mxu1 %v2724_v27  ;;  %1535 = vmatprep.subr.bf16.mxu0 %v2735_v30  ;;  %v2814_v27 = vld [vmem:[#allocation5 + $0x548] ss:$16 sps:$4 sm:$0xff]  }
  0xc4   :  { %1520 = vmatprep.subr.bf16.mxu1 %v2732_v29  ;;  %v2822_v29 = vld [vmem:[#allocation5 + $0x52c] ss:$16 sps:$4 sm:$0xff]   ;;  %v2820_v30 = vld [vmem:[#allocation5 + $0x528] ss:$16 sps:$4 sm:$0xff]  }
  0xc6   :  { %1536 = vmatpush1.bf16.msra.mxu0 %v2733_v32  ;;  %v2823_v32 = vld [vmem:[#allocation5 + $0x508] ss:$16 sps:$4 sm:$0xff]  }
  0xc7   :  { %1521 = vmatpush2.bf16.msra.mxu1 %v2730_v31  ;;  %1537 = vmatprep.subr.bf16.mxu0 %v2741_v34  ;;  %v2825_v31 = vld [vmem:[#allocation5 + $0x50c] ss:$16 sps:$4 sm:$0xff]   ;;  %v2826_v34 = vld [vmem:[#allocation5 + $0x608] ss:$16 sps:$4 sm:$0xff]  }
  0xc8   :  { %1576 = vmatprep.subr.bf16.mxu1 %v2738_v33  ;;  %v2828_v33 = vld [vmem:[#allocation5 + $0x60c] ss:$16 sps:$4 sm:$0xff]  }
  0xca   :  { %1523 = vmatmul.mubr.bf16.vlgmr.msra.gmra.mxu1 %v3109_v12  ;;  %1538 = vmatpush1.bf16.msra.mxu0 %v2739_v36  ;;  %v2765_v12 = vld [vmem:[#allocation5 + $0x22c] ss:$16 sps:$4 sm:$0xff]  }
  0xcb   :  { %1577 = vmatpush1.bf16.msra.mxu1 %v2736_v35  ;;  %1539 = vmatprep.subr.bf16.mxu0 %v2747_v38  ;;  %v2829_v35 = vld [vmem:[#allocation8 + $0x78] sm:$0xff]   ;;  %v2833_v38 = vld [vmem:[#allocation8 + $0x68] sm:$0xff]  }
  0xcc   :  { %1578 = vmatprep.subr.bf16.mxu1 %v2744_v37  ;;  %1608 = vmatprep.mubr.bf16.mxu1 %v3121_v44  ;;  %v2766_v44 = vld [vmem:[#allocation5 + $0x448] ss:$16 sps:$4 sm:$0xff]   ;;  %v2830_v36 = vld [vmem:[#allocation8 + $0x38] sm:$0xff]  }
  0xcd   :  { %v2832_v37 = vld [vmem:[#allocation8 + $0x30] sm:$0xff]  }
  0xce   :  { %1540 = vmatpush1.bf16.msra.mxu0 %v2745_v40  ;;  %v2835_v40 = vld [vmem:[#allocation8 + $0x60] sm:$0xff]  }
  0xcf   :  { %1579 = vmatpush1.bf16.msra.mxu1 %v2742_v39  ;;  %1541 = vmatprep.subr.bf16.mxu0 %v2753_v42  ;;  %v2834_v39 = vld [vmem:[#allocation8 + $0x28] sm:$0xff]   ;;  %v2840_v42 = vld [vmem:[#allocation8 + $0x10] sm:$0xff]  }
  0xd0   :  { %1580 = vmatprep.subr.bf16.mxu1 %v2750_v41  ;;  %v2837_v41 = vld [vmem:[#allocation8 + $0x58] sm:$0xff]  }
  0xd2   :  { %1542 = vmatpush1.bf16.msra.mxu0 %v2751_v45  ;;  %v2842_v45 = vld [vmem:[#allocation8 + $0x8] sm:$0xff]  }
  0xd3   :  { %1581 = vmatpush1.bf16.msra.mxu1 %v2748_v43  ;;  %1543 = vmatprep.subr.bf16.mxu0 %v2759_v46  ;;  %v2841_v43 = vld [vmem:[#allocation8 + $0x48] sm:$0xff]   ;;  %v2844_v46 = vld [vmem:[#allocation8] sm:$0xff]  }
  0xd4   :  { %1582 = vmatprep.subr.bf16.mxu1 %v2756_v54  ;;  %v2843_v54 = vld [vmem:[#allocation8 + $0x40] sm:$0xff]  }
  0xd6   :  { %1544 = vmatpush1.bf16.msra.mxu0 %v2757_v48  ;;  %v2846_v48 = vld [vmem:[#allocation8 + $0xb8] sm:$0xff]  }
  0xd7   :  { %1583 = vmatpush1.bf16.msra.mxu1 %v2754_v47  ;;  %1545 = vmatprep.subr.bf16.mxu0 %v2765_v12  ;;  %v2845_v47 = vld [vmem:[#allocation8 + $0xf8] sm:$0xff]   ;;  %v2848_v12 = vld [vmem:[#allocation8 + $0xb0] sm:$0xff]  }
  0xd8   :  { %1584 = vmatprep.subr.bf16.mxu1 %v2762_v49  ;;  %v2847_v49 = vld [vmem:[#allocation8 + $0xf0] sm:$0xff]  }
  0xda   :  { %1546 = vmatpush1.bf16.msra.mxu0 %v2763_v51  ;;  %v2850_v51 = vld [vmem:[#allocation8 + $0xa8] sm:$0xff]  }
  0xdb   :  { %1585 = vmatpush1.bf16.msra.mxu1 %v2760_v50  ;;  %1547 = vmatprep.subr.bf16.mxu0 %v2771_v53  ;;  %v2849_v50 = vld [vmem:[#allocation8 + $0xe8] sm:$0xff]   ;;  %v2852_v53 = vld [vmem:[#allocation8 + $0xa0] sm:$0xff]  }
  0xdc   :  { %1586 = vmatprep.subr.bf16.mxu1 %v2768_v52  ;;  %v2851_v52 = vld [vmem:[#allocation8 + $0xe0] sm:$0xff]  }
  0xde   :  { %1548 = vmatpush1.bf16.msra.mxu0 %v2769_v55  ;;  %v2853_v55 = vld [vmem:[#allocation8 + $0xd8] sm:$0xff]  }
  0xdf   :  { %1587 = vmatpush1.bf16.msra.mxu1 %v2766_v44  ;;  %1549 = vmatprep.subr.bf16.mxu0 %v2777_v57  ;;  %v2854_v57 = vld [vmem:[#allocation8 + $0x98] sm:$0xff]  }
  0xe0   :  { %1588 = vmatprep.subr.bf16.mxu1 %v2774_v56  ;;  %v314_v56 = vlaneseq }
  0xe2   :  { %1550 = vmatpush2.bf16.msra.mxu0 %v2775_v59 }
  0xe3   :  { %1589 = vmatpush1.bf16.msra.mxu1 %v2772_v58  ;;  %1551 = vmatprep.subr.bf16.mxu0 %v2783_v61  ;;  %v2855_v58 = vld [vmem:[#allocation8 + $0xd0] sm:$0xff]  }
  0xe4   :  { %1590 = vmatprep.subr.bf16.mxu1 %v2780_v60  ;;  %v3135_v60 = vshrl.u32 %v314_v56, 7  ;;  %v2856_v61 = vld [vmem:[#allocation8 + $0x90] sm:$0xff]  }
  0xe6   :  { %1552 = vmatpush2.bf16.msra.mxu0 %v2781_v63  ;;  %v2857_v63 = vld [vmem:[#allocation8 + $0xc8] sm:$0xff]  }
  0xe7   :  { %1591 = vmatpush1.bf16.msra.mxu1 %v2778_v62  ;;  %1553 = vmatprep.subr.bf16.mxu0 %v2789_v1  ;;  %v316_v1 = vsub.s32 0, %v3135_v60 }
  0xe8   :  { %1592 = vmatprep.subr.bf16.mxu1 %v2786_v0 }
  0xea   :  { %1554 = vmatpush2.bf16.msra.mxu0 %v2787_v3  ;;  %v3138_v3 = vld [vmem:[#allocation7] sm:$0xf] }
  0xeb   :  { %1593 = vmatpush2.bf16.msra.mxu1 %v2784_v2  ;;  %1555 = vmatprep.subr.bf16.mxu0 %v2795_v5  ;;  %v2858_v2 = vld [vmem:[#allocation8 + $0x88] sm:$0xff]   ;;  %v2859_v5 = vld [vmem:[#allocation8 + $0xc0] sm:$0xff]  }
  0xec   :  { %1594 = vmatprep.subr.bf16.mxu1 %v2792_v4 }
  0xee   :  { %1556 = vmatpush2.bf16.msra.mxu0 %v2793_v7 }
  0xef   :  { %1595 = vmatpush2.bf16.msra.mxu1 %v2790_v6  ;;  %1557 = vmatprep.subr.bf16.mxu0 %v2801_v9  ;;  %v320_v6 = vsub.s32 1, %v3135_v60  ;;  %v2860_v9 = vld [vmem:[#allocation8 + $0x80] sm:$0xff]  }
  0xf0   :  { %1596 = vmatprep.subr.bf16.mxu1 %v2798_v8  ;;  %v317_v8 = vrot.slane %v3138_v3, %v316_v1 }
  0xf2   :  { %1558 = vmatpush2.bf16.msra.mxu0 %v2799_v11  ;;  %v321_v11 = vrot.slane %v3138_v3, %v320_v6 }
  0xf3   :  { %1597 = vmatpush2.bf16.msra.mxu1 %v2796_v10  ;;  %1559 = vmatprep.subr.bf16.mxu0 %v2807_v15 }
  0xf4   :  { %1598 = vmatprep.subr.bf16.mxu1 %v2804_v14 }
  0xf6   :  { %1560 = vmatpush2.bf16.msra.mxu0 %v2805_v17 }
  0xf7   :  { %1599 = vmatpush2.bf16.msra.mxu1 %v2802_v16  ;;  %1561 = vmatprep.subr.bf16.mxu0 %v2813_v19 }
  0xf8   :  { %1600 = vmatprep.subr.bf16.mxu1 %v2810_v18 }
  0xfa   :  { %1562 = vmatpush2.bf16.msra.mxu0 %v2811_v22 }
  0xfb   :  { %1601 = vmatpush2.bf16.msra.mxu1 %v2808_v20  ;;  %1563 = vmatprep.subr.bf16.mxu0 %v2819_v25 }
  0xfc   :  { %1602 = vmatprep.subr.bf16.mxu1 %v2816_v24 }
  0xfe   :  { %1564 = vmatpush2.bf16.msra.mxu0 %v2817_v28 }
  0xff   :  { %1603 = vmatpush2.bf16.msra.mxu1 %v2814_v27  ;;  %2445 = vmatprep.subr.bf16.mxu0 %v2829_v35 }
 0x100   :  { %1604 = vmatprep.subr.bf16.mxu1 %v2822_v29 }
 0x101   :  { %1566 = vmatmul.mubr.bf16.vlgmr.msra.gmra.mxu0 %v3111_v13  ;;  %v2831_v13 = vld [vmem:[#allocation8 + $0x70] sm:$0xff]  }
 0x102   :  { %2446 = vmatpush3.bf16.msra.mxu0 %v2830_v36 }
 0x103   :  { %1605 = vmatpush2.bf16.msra.mxu1 %v2820_v30  ;;  %2447 = vmatprep.subr.bf16.mxu0 %v2831_v13 }
 0x104   :  { %1606 = vmatprep.subr.bf16.mxu1 %v2825_v31 }
 0x106   :  { %2448 = vmatpush3.bf16.msra.mxu0 %v2832_v37 }
 0x107   :  { %1607 = vmatpush2.bf16.msra.mxu1 %v2823_v32  ;;  %2449 = vmatprep.subr.bf16.mxu0 %v2833_v38 }
 0x108   :  { %1633 = vmatprep.subr.bf16.mxu1 %v2828_v33 }
 0x10a   :  { %1609 = vmatmul.mubr.bf16.vlgmr.msra.gmra.mxu1 %v3124_v26  ;;  %2450 = vmatpush3.bf16.msra.mxu0 %v2834_v39  ;;  %v2836_v26 = vld [vmem:[#allocation8 + $0x20] sm:$0xff]  }
 0x10b   :  { %1634 = vmatpush1.bf16.msra.mxu1 %v2826_v34  ;;  %1651 = vmatprep.mubr.bf16.mxu1 %v3036_v21  ;;  %v2838_v21 = vld [vmem:[#allocation8 + $0x18] sm:$0xff]  }
 0x10c   :  { %2451 = vmatprep.subr.bf16.mxu0 %v2835_v40  ;;  %2467 = vmatprep.subr.bf16.mxu1 %v2845_v47 }
 0x10e   :  { %2452 = vmatpush3.bf16.msra.mxu0 %v2836_v26 }
 0x10f   :  { %2453 = vmatprep.subr.bf16.mxu0 %v2837_v41 }
 0x112   :  { %2397 = vmatmul.mubr.msk.bf16.vlgmr.msra.gmra.mxu1 %vm1314_vm0, %v3116_v23  ;;  %v2839_v23 = vld [vmem:[#allocation8 + $0x50] sm:$0xff]   ;;  %2454 = vmatpush3.bf16.msra.mxu0 %v2838_v21 }
 0x113   :  { %2455 = vmatprep.subr.bf16.mxu0 %v2839_v23  ;;  %2468 = vmatpush3.bf16.msra.mxu1 %v2846_v48 }
 0x114   :  { %2469 = vmatprep.subr.bf16.mxu1 %v2847_v49 }
 0x116   :  { %2456 = vmatpush3.bf16.msra.mxu0 %v2840_v42 }
 0x117   :  { %2457 = vmatprep.subr.bf16.mxu0 %v2841_v43  ;;  %2470 = vmatpush3.bf16.msra.mxu1 %v2848_v12 }
 0x118   :  { %2471 = vmatprep.subr.bf16.mxu1 %v2849_v50 }
 0x11a   :  { %2458 = vmatpush3.bf16.msra.mxu0 %v2842_v45 }
 0x11b   :  { %2459 = vmatprep.subr.bf16.mxu0 %v2843_v54  ;;  %2472 = vmatpush3.bf16.msra.mxu1 %v2850_v51 }
 0x11c   :  { %2473 = vmatprep.subr.bf16.mxu1 %v2851_v52 }
 0x11e   :  { %2460 = vmatpush3.bf16.msra.mxu0 %v2844_v46 }
 0x11f   :  { %2474 = vmatpush3.bf16.msra.mxu1 %v2852_v53 }
 0x120   :  { %2475 = vmatprep.subr.bf16.mxu1 %v2853_v55 }
 0x123   :  { %2476 = vmatpush3.bf16.msra.mxu1 %v2854_v57  ;;  %v328_v57 = vsub.s32 3, %v3135_v60 }
 0x124   :  { %2477 = vmatprep.subr.bf16.mxu1 %v2855_v58 }
 0x127   :  { %2478 = vmatpush3.bf16.msra.mxu1 %v2856_v61 }
 0x128   :  { %2479 = vmatprep.subr.bf16.mxu1 %v2857_v63  ;;  %v329_v63 = vrot.slane %v3138_v3, %v328_v57 }
 0x12b   :  { %2480 = vmatpush3.bf16.msra.mxu1 %v2858_v2 }
 0x12c   :  { %2481 = vmatprep.subr.bf16.mxu1 %v2859_v5 }
 0x12f   :  { %2482 = vmatpush3.bf16.msra.mxu1 %v2860_v9 }
 0x141   :  { %v1352_v62 = vpop.f32.mrf.mxu0 }
 0x142   :  { %v1395_v44 = vpop.f32.mrf.mxu1  ;;  %v1353_v15 = vadd.f32 %v1352_v62, %v317_v8 }
 0x143   :  { %v1354_v4 = vpop.f32.mrf.mxu0 }
 0x144   :  { %v1397_v59 = vpop.f32.mrf.mxu1  ;;  %v1355_v17 = vadd.f32 %v1354_v4, %v321_v11  ;;  %v1396_v22 = vadd.f32 %v1395_v44, %v1353_v15  ;;  %v324_v44 = vsub.s32 2, %v3135_v60 }
 0x145   :  { %v1356_v10 = vpop.f32.mrf.mxu0 }
 0x146   :  { %v1399_v0 = vpop.f32.mrf.mxu1  ;;  %v1357_v18 = vadd.f32 %v1356_v10, %v317_v8  ;;  %v1398_v27 = vadd.f32 %v1397_v59, %v1355_v17  ;;  %v325_v59 = vrot.slane %v3138_v3, %v324_v44 }
 0x147   :  { %v1358_v16 = vpop.f32.mrf.mxu0 }
 0x148   :  { %v1401_v7 = vpop.f32.mrf.mxu1  ;;  %v1359_v24 = vadd.f32 %v1358_v16, %v321_v11  ;;  %v1400_v28 = vadd.f32 %v1399_v0, %v1357_v18 }
 0x14a   :  { %v1481_v14 = vpop.f32.mrf.mxu1  ;;  %v1402_v32 = vadd.f32 %v1401_v7, %v1359_v24 }
 0x14c   :  { %v1483_v19 = vpop.f32.mrf.mxu1 }
 0x14e   :  { %v1485_v30 = vpop.f32.mrf.mxu1 }
 0x150   :  { %v1487_v38 = vpop.f32.mrf.mxu1 }
 0x181   :  { %v1438_v20 = vpop.f32.mrf.mxu0 }
 0x182   :  { %v1439_v29 = vadd.f32 %v1438_v20, %v1396_v22 }
 0x183   :  { %v1440_v25 = vpop.f32.mrf.mxu0 }
 0x184   :  { %v1441_v33 = vadd.f32 %v1440_v25, %v1398_v27  ;;  %v1482_v36 = vadd.f32 %v1481_v14, %v1439_v29 }
 0x185   :  { %v1442_v31 = vpop.f32.mrf.mxu0 }
 0x186   :  { %v1443_v34 = vadd.f32 %v1442_v31, %v1400_v28  ;;  %v1484_v39 = vadd.f32 %v1483_v19, %v1441_v33 }
 0x187   :  { %v1444_v35 = vpop.f32.mrf.mxu0 }
 0x188   :  { %v1486_v13 = vadd.f32 %v1485_v30, %v1443_v34  ;;  %v1445_v37 = vadd.f32 %v1444_v35, %v1402_v32 }
 0x18a   :  { %v1662_v40 = vpack.c.bf16 %v1486_v13, %v1482_v36  ;;  %v1488_v26 = vadd.f32 %v1487_v38, %v1445_v37  ;;  %v1524_v12 = vpop.f32.mrf.mxu1  ;;  %v2861_v37 = vld [vmem:[#allocation10 + $0x38] sm:$0xff]   ;;  %v3037_v38 = vmov 0.0  }
 0x18b   :  { %v1525_v1 = vadd.f32 %v1524_v12, %v325_v59  ;;  %2498 = vmatprep.subr.bf16.mxu0 %v3037_v38 }
 0x18c   :  { %v2398_v41 = vmul.bf16 3216621497, %v1662_v40  ;;  %v1663_v21 = vpack.c.bf16 %v1488_v26, %v1484_v39  ;;  %v1526_v50 = vpop.f32.mrf.mxu1  ;;  %v2862_v39 = vld [vmem:[#allocation10 + $0x30] sm:$0xff]   ;;  %v2863_v40 = vld [vmem:[#allocation10 + $0x28] sm:$0xff]   ;;  %v2864_v26 = vld [vmem:[#allocation10 + $0x20] sm:$0xff]  }
 0x18d   :  { %v1527_v6 = vadd.f32 %v1526_v50, %v329_v63  ;;  %v2402_v50 = vld [vmem:[%s3160_s4] ss:$0 sm:$0xff]  ;;  %s3039_s4 = smov [#allocation11]  }
 0x18e   :  { %2869 = vpow.bf16 %v2398_v41  ;;  %v2399_v23 = vmul.bf16 3216621497, %v1663_v21  ;;  %v1528_v51 = vpop.f32.mrf.mxu1  ;;  %v2865_v41 = vld [vmem:[#allocation10 + $0x18] sm:$0xff]   ;;  %v2866_v21 = vld [vmem:[#allocation10 + $0x10] sm:$0xff]  }
 0x18f   :  { %v1529_v2 = vadd.f32 %v1528_v51, %v325_v59 }
 0x190   :  { %2871 = vpow.bf16 %v2399_v23  ;;  %v1530_v53 = vpop.f32.mrf.mxu1  ;;  %v2867_v23 = vld [vmem:[#allocation10 + $0x8] sm:$0xff]  }
 0x191   :  { %v1531_v7 = vadd.f32 %v1530_v53, %v329_v63 }
 0x19c   :  { %v2870_v42 = vpop.eup %2869 }
 0x19d   :  { %v1682_v43 = vadd.bf16 1065369472, %v2870_v42  ;;  %v2868_v42 = vld [vmem:[#allocation10] sm:$0xff]  }
 0x19e   :  { %v2872_v45 = vpop.eup %2871 }
 0x19f   :  { %v1683_v54 = vadd.bf16 1065369472, %v2872_v45  ;;  %2873 = vrcp.bf16 %v1682_v43 }
 0x1a1   :  { %2875 = vrcp.bf16 %v1683_v54 }
 0x1ad   :  { %v2874_v46 = vpop.eup %2873 }
 0x1ae   :  { %v1687_v49 = vmul.bf16 1065369472, %v2874_v46 }
 0x1af   :  { %v2876_v47 = vpop.eup %2875 }
 0x1b0   :  { %v1689_v48 = vmul.bf16 1065369472, %v2876_v47 }
 0x1b2   :  { %1989 = vmatprep.mubr.bf16.mxu0 %v1689_v48 }
 0x1b3   :  { %1990 = vmatmul.mubr.bf16.vlgmr.msra.gmra.mxu0 %v1687_v49 }
 0x1b4   :  { %2499 = vmatpush3.bf16.msra.mxu0 %v2861_v37  ;;  %2514 = vmatprep.mubr.msk.bf16.mxu0 %vm3038_vm1, %v3037_v38 }
 0x1b5   :  { %2500 = vmatprep.subr.bf16.mxu0 %v3037_v38 }
 0x1b8   :  { %2501 = vmatpush3.bf16.msra.mxu0 %v2862_v39 }
 0x1b9   :  { %2502 = vmatprep.subr.bf16.mxu0 %v3037_v38 }
 0x1bc   :  { %2503 = vmatpush3.bf16.msra.mxu0 %v2863_v40 }
 0x1bd   :  { %2504 = vmatprep.subr.bf16.mxu0 %v3037_v38 }
 0x1c0   :  { %2505 = vmatpush3.bf16.msra.mxu0 %v2864_v26 }
 0x1c1   :  { %v1567_v52 = vpop.f32.mrf.mxu0  ;;  %2506 = vmatprep.subr.bf16.mxu0 %v3037_v38 }
 0x1c2   :  { %v1568_v8 = vadd.f32 %v1567_v52, %v1525_v1 }
 0x1c3   :  { %v1569_v55 = vpop.f32.mrf.mxu0 }
 0x1c4   :  { %v1570_v11 = vadd.f32 %v1569_v55, %v1527_v6  ;;  %2507 = vmatpush3.bf16.msra.mxu0 %v2865_v41 }
 0x1c5   :  { %v1571_v61 = vpop.f32.mrf.mxu0  ;;  %2508 = vmatprep.subr.bf16.mxu0 %v3037_v38 }
 0x1c6   :  { %v1572_v9 = vadd.f32 %v1571_v61, %v1529_v2  ;;  %v2436_v2 = vld [vmem:[%s3162_s6] ss:$0 sm:$0xff]  ;;  %s2186_s6 = sshll.u32 %s3039_s4, 4  ;;  %s2187_s6 = int_to_ptr.vmem [resolvable:$true] %s2186_s6 }
 0x1c7   :  { %v1573_v4 = vpop.f32.mrf.mxu0  ;;  %s2997_s8 = scalar_lea.vmem %s2187_s6, 256  ;;  %p3002_p12 = scmp.lt.s32.totalorder %s2187_s6, %s2187_s6 }
 0x1c8   :  { %v1574_v14 = vadd.f32 %v1573_v4, %v1531_v7  ;;  %2509 = vmatpush3.bf16.msra.mxu0 %v2866_v21  ;;  %p2998_p11 = scmp.ne.s32.totalorder %s2187_s6, %s2997_s8  ;;  %p3003_p13 = scmp.lt.s32.totalorder %s2997_s8, %s2997_s8 }
 0x1c9   :  { %2510 = vmatprep.subr.bf16.mxu0 %v3037_v38 }
 0x1ca   :  { %v1610_v56 = vpop.f32.mrf.mxu1  ;;  %p3004_p0 = por %p3003_p13, %p3002_p12 }
 0x1cb   :  { %v1611_v60 = vadd.f32 %v1610_v56, %v1568_v8 }
 0x1cc   :  { %v1612_v58 = vpop.f32.mrf.mxu1  ;;  %2511 = vmatpush3.bf16.msra.mxu0 %v2867_v23  ;;  %p3005_p1 = pnand %p3004_p0, %p2998_p11 }
 0x1cd   :  { %v1613_v17 = vadd.f32 %v1612_v58, %v1570_v11  ;;  %2512 = vmatprep.subr.bf16.mxu0 %v3037_v38 }
 0x1ce   :  { %v1614_v62 = vpop.f32.mrf.mxu1 }
 0x1cf   :  { %v1615_v15 = vadd.f32 %v1614_v62, %v1572_v9 }
 0x1d0   :  { %v1616_v0 = vpop.f32.mrf.mxu1  ;;  %2513 = vmatpush3.bf16.msra.mxu0 %v2868_v42 }
 0x1d1   :  { %v1617_v18 = vadd.f32 %v1616_v0, %v1574_v14 }
 0x1d2   :  { %v1653_v5 = vpop.f32.mrf.mxu1 }
 0x1d3   :  { %v1654_v19 = vadd.f32 %v1653_v5, %v1611_v60 }
 0x1d4   :  { %v1655_v10 = vpop.f32.mrf.mxu1 }
 0x1d5   :  { %v1656_v22 = vadd.f32 %v1655_v10, %v1613_v17 }
 0x1d6   :  { %v1657_v16 = vpop.f32.mrf.mxu1 }
 0x1d7   :  { %v1658_v20 = vadd.f32 %v1657_v16, %v1615_v15 }
 0x1d8   :  { %v1659_v3 = vpop.f32.mrf.mxu1 }
 0x1d9   :  { %v1664_v24 = vpack.c.bf16 %v1658_v20, %v1654_v19  ;;  %v1660_v25 = vadd.f32 %v1659_v3, %v1617_v18 }
 0x1db   :  { %v2400_v27 = vmul.bf16 3216621497, %v1664_v24  ;;  %v1665_v28 = vpack.c.bf16 %v1660_v25, %v1656_v22 }
 0x1dd   :  { %2877 = vpow.bf16 %v2400_v27  ;;  %v2401_v29 = vmul.bf16 3216621497, %v1665_v28 }
 0x1df   :  { %2879 = vpow.bf16 %v2401_v29 }
 0x1eb   :  { %v2878_v30 = vpop.eup %2877 }
 0x1ec   :  { %v1684_v31 = vadd.bf16 1065369472, %v2878_v30 }
 0x1ed   :  { %v2880_v32 = vpop.eup %2879 }
 0x1ee   :  { %v1685_v33 = vadd.bf16 1065369472, %v2880_v32  ;;  %2881 = vrcp.bf16 %v1684_v31 }
 0x1f0   :  { %2883 = vrcp.bf16 %v1685_v33 }
 0x1fc   :  { %v2882_v34 = vpop.eup %2881 }
 0x1fd   :  { %v1691_v13 = vmul.bf16 1065369472, %v2882_v34 }
 0x1fe   :  { %v2884_v35 = vpop.eup %2883 }
 0x1ff   :  { %v1693_v36 = vmul.bf16 1065369472, %v2884_v35 }
 0x201   :  { %2030 = vmatprep.mubr.bf16.mxu1 %v1693_v36 }
 0x202   :  { %2031 = vmatmul.mubr.bf16.vlgmr.msra.gmra.mxu1 %v1691_v13 }
 0x273   :  { %v2461_v43 = vpop.f32.mrf.mxu0 }
 0x275   :  { %v2462_v45 = vpop.f32.mrf.mxu0 }
 0x276   :  { %v2463_v49 = vadd.f32 %v2462_v45, %v2461_v43 }
 0x277   :  { %v2464_v54 = vpop.f32.mrf.mxu0 }
 0x278   :  { %v1992_v44 = vadd.f32 %v2463_v49, %v2402_v50 }
 0x279   :  { %v2465_v46 = vpop.f32.mrf.mxu0 }
 0x27a   :  { %v2466_v12 = vadd.f32 %v2465_v46, %v2464_v54 }
 0x27c   :  { %v1995_v55 = vadd.f32 %v2466_v12, %v2402_v50 }
 0x2c2   :  { %v2483_v47 = vpop.f32.mrf.mxu1 }
 0x2c4   :  { %v2484_v48 = vpop.f32.mrf.mxu1 }
 0x2c5   :  { %v2485_v52 = vadd.f32 %v2484_v48, %v2483_v47 }
 0x2c6   :  { %v2486_v51 = vpop.f32.mrf.mxu1 }
 0x2c7   :  { %v2033_v57 = vadd.f32 %v2485_v52, %v1992_v44 }
 0x2c8   :  { %v2487_v53 = vpop.f32.mrf.mxu1 }
 0x2c9   :  { %v2488_v56 = vadd.f32 %v2487_v53, %v2486_v51 }
 0x2cb   :  { %v2036_v58 = vadd.f32 %v2488_v56, %v1995_v55 }
 0x2cd   :  { %v2039_v59 = vpack.c.bf16 %v2036_v58, %v2033_v57 }
 0x2cf   :  { %v2435_v61 = vmul.bf16 3216621497, %v2039_v59 }
 0x2d1   :  { %2885 = vpow.bf16 %v2435_v61 }
 0x2df   :  { %v2886_v62 = vpop.eup %2885 }
 0x2e0   :  { %v2044_v63 = vadd.bf16 1065369472, %v2886_v62 }
 0x2e2   :  { %2887 = vrcp.bf16 %v2044_v63 }
 0x2f0   :  { %v2888_v0 = vpop.eup %2887 }
 0x2f1   :  { %v2046_v1 = vmul.bf16 1065369472, %v2888_v0 }
 0x2f3   :  { %2515 = vmatmul.mubr.bf16.vlgmr.msra.gmra.mxu0 %v2046_v1 }
 0x3b3   :  { %v2152_v4 = vpop.f32.mrf.mxu0 }
 0x3b4   :  { %v2153_v5 = vadd.f32 %v2436_v2, %v2152_v4 }
 0x3b5   :  { %v2516_v6 = vpop.f32.mrf.mxu0 }
 0x3b6   :  { %2159 = vmax.xlane.f32.xlu0 %v2153_v5 }
 0x3b7   :  { %v2155_v7 = vpop.f32.mrf.mxu0 }
 0x3b8   :  { %v2156_v8 = vadd.f32 %v2436_v2, %v2155_v7 }
 0x3b9   :  { %v2517_v9 = vpop.f32.mrf.mxu0 }
 0x3ba   :  { %2161 = vmax.xlane.f32.xlu0 %v2156_v8 }
 0x43f   :  { %v2160_v10 = vpop.xlane.xlu0 %2159 }
 0x440   :  { %v2163_v11 = vsub.f32 %v2153_v5, %v2160_v10 }
 0x442   :  { %v2165_v14 = vmul.f32 1.442695, %v2163_v11 }
 0x443   :  { %v2162_v60 = vpop.xlane.xlu0 %2161 }
 0x444   :  { %v2164_v15 = vsub.f32 %v2156_v8, %v2162_v60  ;;  %2889 = vpow2.f32 %v2165_v14 }
 0x446   :  { %v2167_v16 = vmul.f32 1.442695, %v2164_v15 }
 0x448   :  { %2891 = vpow2.f32 %v2167_v16 }
 0x451   :  { %v2890_v17 = vpop.eup %2889 }
 0x452   :  { %2169 = vadd.xlane.f32.xlu1 %v2890_v17 }
 0x455   :  { %v2892_v18 = vpop.eup %2891 }
 0x456   :  { %2171 = vadd.xlane.f32.xlu1 %v2892_v18 }
 0x4db   :  { %v2170_v19 = vpop.xlane.xlu1 %2169 }
 0x4dc   :  { %2893 = vlog2.f32 %v2170_v19 }
 0x4df   :  { %v2172_v20 = vpop.xlane.xlu1 %2171 }
 0x4e0   :  { %2895 = vlog2.f32 %v2172_v20 }
 0x4e9   :  { %v2894_v3 = vpop.eup %2893 }
 0x4ea   :  { %v2174_v22 = vmul.f32 0.6931472, %v2894_v3 }
 0x4ec   :  { %v2177_v24 = vsub.f32 %v2163_v11, %v2174_v22 }
 0x4ed   :  { %v2896_v25 = vpop.eup %2895 }
 0x4ee   :  { %2179 = vst [vmem:[#allocation11] sm:$0xff] %v2177_v24  ;;  %v2176_v27 = vmul.f32 0.6931472, %v2896_v25 }
 0x4f0   :  { %v2178_v28 = vsub.f32 %v2164_v15, %v2176_v27 }
 0x4f2   :  { %2180 = vst [vmem:[#allocation11 + $0x8] sm:$0xff] %v2178_v28 }
 0x4f3   :  { %3008 = shalt.err (!%p3005_p1)
}
 0x4f4   :  { %s3040_s9 = smov 128   ;;  %s3041_s10 = smov 8  }
 0x4f5   :  { %2192 = dma.vmem_to_hbm [thread:$0]  %s2187_s6, 256, %s3163_s7, [#allocation4], %s3040_s9, %s3040_s9, %s3041_s10  }
 0x4f6   :  { %3023 = dma.done.wait [#allocation4], 256  }
 0x4f7   :  { %3024 = vsyncadd [#allocation4], 4294967040 }
 0x4f8   :  { %2196 = vsyncpa [#allocation3], 1 }
 0x4f9   :  { %2197 = vsyncpa [#allocation6], 1 }
 0x4fa   :  { %2198 = vsyncpa [#allocation9], 1 }
 0x4fb   :  { %2199 = vsyncpa [#allocation4], 1 }

</bundles_post_ra>
